<compile_context>
chip_gen: v7x
topology: tpu7x:2x2x1
jax: 0.10.0
libtpu: 0.0.40
codegen_flags: <defaults>
</compile_context>

<pallas_src>
import jax
import jax.numpy as jnp
from jax.experimental import pallas as pl
from jax.experimental.pallas import tpu as pltpu

# ---------------- hyperparameters (small, consistent with the module) -------
N_CLASS = 16    # vocab size / output classes
EMB_SIZE = 32   # embedding dim
N_HIDDEN = 32   # LSTM hidden dim
BATCH = 2
SEQ_LEN = 8
N_LAYERS = 2


# ---------------- fused Pallas kernel ----------------------------------------
def _text_lstm_kernel(tok_ref, emb_ref, wx_ref, wh_ref, b_ref, h0_ref, c0_ref,
                      wn_ref, bn_ref, wout_ref, bout_ref, o_ref):
    """Entire TextLSTM forward: embedding -> L LSTM layers -> classifier."""
    # --- embedding lookup as a one-hot MXU matmul (no in-kernel gather) -----
    tok = tok_ref[...]                                              # (S*B, 1) int32
    cls_iota = jax.lax.broadcasted_iota(jnp.int32, (SEQ_LEN * BATCH, N_CLASS), 1)
    onehot = (cls_iota == tok).astype(jnp.float32)                  # (S*B, n_class)
    x = jnp.dot(onehot, emb_ref[...],
                preferred_element_type=jnp.float32)                 # (S*B, emb)

    # --- lane mask selecting the g-gate segment of the fused 4*nh gates -----
    lane = jax.lax.broadcasted_iota(jnp.int32, (BATCH, 4 * N_HIDDEN), 1)
    g_mask = (lane >= 2 * N_HIDDEN) & (lane < 3 * N_HIDDEN)

    def run_layer(x_all, layer):
        """x_all: (seq*batch, emb) time-major.  Returns list of per-step h."""
        wh = wh_ref[layer]                                          # (nh, 4*nh)
        # Hoisted input projection: one matmul covers all timesteps.
        gates_x = (jnp.dot(x_all, wx_ref[layer],
                           preferred_element_type=jnp.float32)
                   + b_ref[layer])                                  # (S*B, 4*nh)
        h = h0_ref[layer]                                           # (B, nh)
        c = c0_ref[layer]                                           # (B, nh)
        hs = []
        for t in range(SEQ_LEN):                                    # fully unrolled
            gx = gates_x[t * BATCH:(t + 1) * BATCH, :]              # static slice
            gates = gx + jnp.dot(h, wh, preferred_element_type=jnp.float32)
            # Two full-vreg EUP passes + lane-mask select (gate order [i|f|g|o]).
            act = jnp.where(g_mask, jnp.tanh(gates), jax.nn.sigmoid(gates))
            i_g = act[:, 0 * N_HIDDEN:1 * N_HIDDEN]
            f_g = act[:, 1 * N_HIDDEN:2 * N_HIDDEN]
            g_g = act[:, 2 * N_HIDDEN:3 * N_HIDDEN]
            o_g = act[:, 3 * N_HIDDEN:4 * N_HIDDEN]
            c = f_g * c + i_g * g_g
            h = o_g * jnp.tanh(c)
            hs.append(h)
        return hs

    # --- layers 0 .. L-2: full h_seq projected back to emb_size with W_n ----
    cur = x
    for l in range(N_LAYERS - 1):
        hs = run_layer(cur, l)
        h_all = jnp.concatenate(hs, axis=0)                         # (S*B, nh)
        cur = (jnp.dot(h_all, wn_ref[...],
                       preferred_element_type=jnp.float32)
               + bn_ref[...])                                       # (S*B, emb)

    # --- last layer: only the final timestep feeds the classifier -----------
    hs = run_layer(cur, N_LAYERS - 1)
    h_last = hs[-1]                                                 # (B, nh)
    o_ref[...] = (jnp.dot(h_last, wout_ref[...],
                          preferred_element_type=jnp.float32)
                  + bout_ref[...])                                  # (B, n_class)


# ---------------- wrapper -----------------------------------------------------
def text_lstm_forward(params, tokens):
    # time-major flatten of the token ids (tiny int glue; all heavy work is
    # inside the single fused pallas_call below)
    tok_tm = jnp.transpose(tokens, (1, 0)).reshape(SEQ_LEN * BATCH, 1)
    tok_tm = tok_tm.astype(jnp.int32)

    vmem = pl.BlockSpec(memory_space=pltpu.MemorySpace.VMEM)
    return pl.pallas_call(
        _text_lstm_kernel,
        out_shape=jax.ShapeDtypeStruct((BATCH, N_CLASS), jnp.float32),
        in_specs=[vmem] * 11,
        out_specs=vmem,
    )(tok_tm, params["emb"], params["wx"], params["wh"], params["b"],
      params["h0"], params["c0"], params["W_n"], params["b_n"],
      params["W_out_T"], params["b_out"])


# ---------------- parameter init (deterministic, matches module shapes) ------
def init_params(key):
    ks = iter(jax.random.split(key, 64))
    nrm = lambda shape: jax.random.normal(next(ks), shape, dtype=jnp.float32)

    wx, wh, b, h0, c0 = [], [], [], [], []
    for _ in range(N_LAYERS):
        # per-gate weights concatenated on the output axis: [i | f | g | o]
        wx.append(jnp.concatenate([nrm((EMB_SIZE, N_HIDDEN)) for _ in range(4)], axis=1))
        wh.append(jnp.concatenate([nrm((N_HIDDEN, N_HIDDEN)) for _ in range(4)], axis=1))
        b.append(jnp.concatenate([nrm((1, N_HIDDEN)) for _ in range(4)], axis=1))
        h0.append(nrm((BATCH, N_HIDDEN)))
        c0.append(nrm((BATCH, N_HIDDEN)))

    return {
        "emb": nrm((N_CLASS, EMB_SIZE)),            # nn.Embedding weight
        "wx": jnp.stack(wx),                        # (L, emb, 4*nh)
        "wh": jnp.stack(wh),                        # (L, nh, 4*nh)
        "b": jnp.stack(b),                          # (L, 1, 4*nh)
        "h0": jnp.stack(h0),                        # (L, batch, nh)
        "c0": jnp.stack(c0),                        # (L, batch, nh)
        "W_n": nrm((N_HIDDEN, EMB_SIZE)),           # inter-layer projection
        "b_n": nrm((1, EMB_SIZE)),
        # classifier weight stored pre-transposed: (nh, n_class)
        "W_out_T": nrm((N_HIDDEN, N_CLASS)),
        "b_out": jnp.ones((1, N_CLASS), jnp.float32),
    }


if __name__ == "__main__":
    key = jax.random.PRNGKey(0)
    k_par, k_tok = jax.random.split(key)
    params = init_params(k_par)
    tokens = jax.random.randint(k_tok, (BATCH, SEQ_LEN), 0, N_CLASS, dtype=jnp.int32)

    out = jax.jit(text_lstm_forward)(params, tokens)
    out = jax.block_until_ready(out)
    assert out.shape == (BATCH, N_CLASS) and out.dtype == jnp.float32
    print("KERNEL_OK")
</pallas_src>

<mosaic_0001>
module attributes {stable_mosaic.version = 11 : i64} {
  func.func @_text_lstm_kernel(%arg0: memref<16x1xi32, #tpu.memory_space<vmem>>, %arg1: memref<16x32xf32, #tpu.memory_space<vmem>>, %arg2: memref<2x32x128xf32, #tpu.memory_space<vmem>>, %arg3: memref<2x32x128xf32, #tpu.memory_space<vmem>>, %arg4: memref<2x1x128xf32, #tpu.memory_space<vmem>>, %arg5: memref<2x2x32xf32, #tpu.memory_space<vmem>>, %arg6: memref<2x2x32xf32, #tpu.memory_space<vmem>>, %arg7: memref<32x32xf32, #tpu.memory_space<vmem>>, %arg8: memref<1x32xf32, #tpu.memory_space<vmem>>, %arg9: memref<32x16xf32, #tpu.memory_space<vmem>>, %arg10: memref<1x16xf32, #tpu.memory_space<vmem>>, %arg11: memref<2x16xf32, #tpu.memory_space<vmem>>) attributes {dimension_semantics = [], scalar_prefetch = 0 : i64, scratch_operands = 0 : i64, tpu.core_type = #tpu.core_type<tc>} {
    %c0 = arith.constant 0 : index
    %c0_0 = arith.constant 0 : index
    %0 = vector.load %arg0[%c0, %c0_0] : memref<16x1xi32, #tpu.memory_space<vmem>>, vector<16x1xi32>
    %1 = tpu.iota {dimensions = array<i32: 1>} : vector<16x16xi32>
    %2 = vector.broadcast %0 : vector<16x1xi32> to vector<16x16xi32>
    %3 = arith.cmpi eq, %1, %2 : vector<16x16xi32>
    %4 = arith.extui %3 : vector<16x16xi1> to vector<16x16xi32>
    %5 = arith.sitofp %4 : vector<16x16xi32> to vector<16x16xf32>
    %c0_1 = arith.constant 0 : index
    %c0_2 = arith.constant 0 : index
    %6 = vector.load %arg1[%c0_1, %c0_2] : memref<16x32xf32, #tpu.memory_space<vmem>>, vector<16x32xf32>
    %cst = arith.constant dense<0.000000e+00> : vector<16x32xf32>
    %7 = tpu.matmul %5, %6, %cst {dimension_numbers = #tpu.dot_dimension_numbers<[1], [0], [0], [1], [0, 0, 1, 1], [], []>} : vector<16x16xf32>, vector<16x32xf32>, vector<16x32xf32> -> vector<16x32xf32>
    %8 = tpu.iota {dimensions = array<i32: 1>} : vector<2x128xi32>
    %c64_i32 = arith.constant 64 : i32
    %9 = vector.broadcast %c64_i32 : i32 to vector<2x128xi32>
    %10 = arith.cmpi sge, %8, %9 : vector<2x128xi32>
    %c96_i32 = arith.constant 96 : i32
    %11 = vector.broadcast %c96_i32 : i32 to vector<2x128xi32>
    %12 = arith.cmpi slt, %8, %11 : vector<2x128xi32>
    %13 = arith.andi %10, %12 : vector<2x128xi1>
    %c0_3 = arith.constant 0 : index
    %c0_4 = arith.constant 0 : index
    %c0_5 = arith.constant 0 : index
    %14 = vector.load %arg3[%c0_3, %c0_4, %c0_5] : memref<2x32x128xf32, #tpu.memory_space<vmem>>, vector<1x32x128xf32>
    %15 = vector.shape_cast %14 : vector<1x32x128xf32> to vector<32x128xf32>
    %c0_6 = arith.constant 0 : index
    %c0_7 = arith.constant 0 : index
    %c0_8 = arith.constant 0 : index
    %16 = vector.load %arg2[%c0_6, %c0_7, %c0_8] : memref<2x32x128xf32, #tpu.memory_space<vmem>>, vector<1x32x128xf32>
    %17 = vector.shape_cast %16 : vector<1x32x128xf32> to vector<32x128xf32>
    %cst_9 = arith.constant dense<0.000000e+00> : vector<16x128xf32>
    %18 = tpu.matmul %7, %17, %cst_9 {dimension_numbers = #tpu.dot_dimension_numbers<[1], [0], [0], [1], [0, 0, 1, 1], [], []>} : vector<16x32xf32>, vector<32x128xf32>, vector<16x128xf32> -> vector<16x128xf32>
    %c0_10 = arith.constant 0 : index
    %c0_11 = arith.constant 0 : index
    %c0_12 = arith.constant 0 : index
    %19 = vector.load %arg4[%c0_10, %c0_11, %c0_12] : memref<2x1x128xf32, #tpu.memory_space<vmem>>, vector<1x1x128xf32>
    %20 = vector.shape_cast %19 : vector<1x1x128xf32> to vector<1x128xf32>
    %21 = vector.broadcast %20 : vector<1x128xf32> to vector<16x128xf32>
    %22 = arith.addf %18, %21 : vector<16x128xf32>
    %c0_13 = arith.constant 0 : index
    %c0_14 = arith.constant 0 : index
    %c0_15 = arith.constant 0 : index
    %23 = vector.load %arg5[%c0_13, %c0_14, %c0_15] : memref<2x2x32xf32, #tpu.memory_space<vmem>>, vector<1x2x32xf32>
    %24 = vector.shape_cast %23 : vector<1x2x32xf32> to vector<2x32xf32>
    %c0_16 = arith.constant 0 : index
    %c0_17 = arith.constant 0 : index
    %c0_18 = arith.constant 0 : index
    %25 = vector.load %arg6[%c0_16, %c0_17, %c0_18] : memref<2x2x32xf32, #tpu.memory_space<vmem>>, vector<1x2x32xf32>
    %26 = vector.shape_cast %25 : vector<1x2x32xf32> to vector<2x32xf32>
    %27 = vector.extract_strided_slice %22 {offsets = [0, 0], sizes = [2, 128], strides = [1, 1]} : vector<16x128xf32> to vector<2x128xf32>
    %cst_19 = arith.constant dense<0.000000e+00> : vector<2x128xf32>
    %28 = tpu.matmul %24, %15, %cst_19 {dimension_numbers = #tpu.dot_dimension_numbers<[1], [0], [0], [1], [0, 0, 1, 1], [], []>} : vector<2x32xf32>, vector<32x128xf32>, vector<2x128xf32> -> vector<2x128xf32>
    %29 = arith.addf %27, %28 : vector<2x128xf32>
    %30 = math.tanh %29 : vector<2x128xf32>
    %31 = arith.negf %29 : vector<2x128xf32>
    %32 = math.exp %31 : vector<2x128xf32>
    %cst_20 = arith.constant 1.000000e+00 : f32
    %33 = vector.broadcast %cst_20 : f32 to vector<2x128xf32>
    %34 = arith.addf %33, %32 : vector<2x128xf32>
    %35 = arith.divf %33, %34 : vector<2x128xf32>
    %36 = arith.select %13, %30, %35 : vector<2x128xi1>, vector<2x128xf32>
    %37 = vector.extract_strided_slice %36 {offsets = [0, 0], sizes = [2, 32], strides = [1, 1]} : vector<2x128xf32> to vector<2x32xf32>
    %38 = vector.extract_strided_slice %36 {offsets = [0, 32], sizes = [2, 32], strides = [1, 1]} : vector<2x128xf32> to vector<2x32xf32>
    %39 = vector.extract_strided_slice %36 {offsets = [0, 64], sizes = [2, 32], strides = [1, 1]} : vector<2x128xf32> to vector<2x32xf32>
    %40 = vector.extract_strided_slice %36 {offsets = [0, 96], sizes = [2, 32], strides = [1, 1]} : vector<2x128xf32> to vector<2x32xf32>
    %41 = arith.mulf %38, %26 : vector<2x32xf32>
    %42 = arith.mulf %37, %39 : vector<2x32xf32>
    %43 = arith.addf %41, %42 : vector<2x32xf32>
    %44 = math.tanh %43 : vector<2x32xf32>
    %45 = arith.mulf %40, %44 : vector<2x32xf32>
    %46 = vector.extract_strided_slice %22 {offsets = [2, 0], sizes = [2, 128], strides = [1, 1]} : vector<16x128xf32> to vector<2x128xf32>
    %cst_21 = arith.constant dense<0.000000e+00> : vector<2x128xf32>
    %47 = tpu.matmul %45, %15, %cst_21 {dimension_numbers = #tpu.dot_dimension_numbers<[1], [0], [0], [1], [0, 0, 1, 1], [], []>} : vector<2x32xf32>, vector<32x128xf32>, vector<2x128xf32> -> vector<2x128xf32>
    %48 = arith.addf %46, %47 : vector<2x128xf32>
    %49 = math.tanh %48 : vector<2x128xf32>
    %50 = arith.negf %48 : vector<2x128xf32>
    %51 = math.exp %50 : vector<2x128xf32>
    %cst_22 = arith.constant 1.000000e+00 : f32
    %52 = vector.broadcast %cst_22 : f32 to vector<2x128xf32>
    %53 = arith.addf %52, %51 : vector<2x128xf32>
    %54 = arith.divf %52, %53 : vector<2x128xf32>
    %55 = arith.select %13, %49, %54 : vector<2x128xi1>, vector<2x128xf32>
    %56 = vector.extract_strided_slice %55 {offsets = [0, 0], sizes = [2, 32], strides = [1, 1]} : vector<2x128xf32> to vector<2x32xf32>
    %57 = vector.extract_strided_slice %55 {offsets = [0, 32], sizes = [2, 32], strides = [1, 1]} : vector<2x128xf32> to vector<2x32xf32>
    %58 = vector.extract_strided_slice %55 {offsets = [0, 64], sizes = [2, 32], strides = [1, 1]} : vector<2x128xf32> to vector<2x32xf32>
    %59 = vector.extract_strided_slice %55 {offsets = [0, 96], sizes = [2, 32], strides = [1, 1]} : vector<2x128xf32> to vector<2x32xf32>
    %60 = arith.mulf %57, %43 : vector<2x32xf32>
    %61 = arith.mulf %56, %58 : vector<2x32xf32>
    %62 = arith.addf %60, %61 : vector<2x32xf32>
    %63 = math.tanh %62 : vector<2x32xf32>
    %64 = arith.mulf %59, %63 : vector<2x32xf32>
    %65 = vector.extract_strided_slice %22 {offsets = [4, 0], sizes = [2, 128], strides = [1, 1]} : vector<16x128xf32> to vector<2x128xf32>
    %cst_23 = arith.constant dense<0.000000e+00> : vector<2x128xf32>
    %66 = tpu.matmul %64, %15, %cst_23 {dimension_numbers = #tpu.dot_dimension_numbers<[1], [0], [0], [1], [0, 0, 1, 1], [], []>} : vector<2x32xf32>, vector<32x128xf32>, vector<2x128xf32> -> vector<2x128xf32>
    %67 = arith.addf %65, %66 : vector<2x128xf32>
    %68 = math.tanh %67 : vector<2x128xf32>
    %69 = arith.negf %67 : vector<2x128xf32>
    %70 = math.exp %69 : vector<2x128xf32>
    %cst_24 = arith.constant 1.000000e+00 : f32
    %71 = vector.broadcast %cst_24 : f32 to vector<2x128xf32>
    %72 = arith.addf %71, %70 : vector<2x128xf32>
    %73 = arith.divf %71, %72 : vector<2x128xf32>
    %74 = arith.select %13, %68, %73 : vector<2x128xi1>, vector<2x128xf32>
    %75 = vector.extract_strided_slice %74 {offsets = [0, 0], sizes = [2, 32], strides = [1, 1]} : vector<2x128xf32> to vector<2x32xf32>
    %76 = vector.extract_strided_slice %74 {offsets = [0, 32], sizes = [2, 32], strides = [1, 1]} : vector<2x128xf32> to vector<2x32xf32>
    %77 = vector.extract_strided_slice %74 {offsets = [0, 64], sizes = [2, 32], strides = [1, 1]} : vector<2x128xf32> to vector<2x32xf32>
    %78 = vector.extract_strided_slice %74 {offsets = [0, 96], sizes = [2, 32], strides = [1, 1]} : vector<2x128xf32> to vector<2x32xf32>
    %79 = arith.mulf %76, %62 : vector<2x32xf32>
    %80 = arith.mulf %75, %77 : vector<2x32xf32>
    %81 = arith.addf %79, %80 : vector<2x32xf32>
    %82 = math.tanh %81 : vector<2x32xf32>
    %83 = arith.mulf %78, %82 : vector<2x32xf32>
    %84 = vector.extract_strided_slice %22 {offsets = [6, 0], sizes = [2, 128], strides = [1, 1]} : vector<16x128xf32> to vector<2x128xf32>
    %cst_25 = arith.constant dense<0.000000e+00> : vector<2x128xf32>
    %85 = tpu.matmul %83, %15, %cst_25 {dimension_numbers = #tpu.dot_dimension_numbers<[1], [0], [0], [1], [0, 0, 1, 1], [], []>} : vector<2x32xf32>, vector<32x128xf32>, vector<2x128xf32> -> vector<2x128xf32>
    %86 = arith.addf %84, %85 : vector<2x128xf32>
    %87 = math.tanh %86 : vector<2x128xf32>
    %88 = arith.negf %86 : vector<2x128xf32>
    %89 = math.exp %88 : vector<2x128xf32>
    %cst_26 = arith.constant 1.000000e+00 : f32
    %90 = vector.broadcast %cst_26 : f32 to vector<2x128xf32>
    %91 = arith.addf %90, %89 : vector<2x128xf32>
    %92 = arith.divf %90, %91 : vector<2x128xf32>
    %93 = arith.select %13, %87, %92 : vector<2x128xi1>, vector<2x128xf32>
    %94 = vector.extract_strided_slice %93 {offsets = [0, 0], sizes = [2, 32], strides = [1, 1]} : vector<2x128xf32> to vector<2x32xf32>
    %95 = vector.extract_strided_slice %93 {offsets = [0, 32], sizes = [2, 32], strides = [1, 1]} : vector<2x128xf32> to vector<2x32xf32>
    %96 = vector.extract_strided_slice %93 {offsets = [0, 64], sizes = [2, 32], strides = [1, 1]} : vector<2x128xf32> to vector<2x32xf32>
    %97 = vector.extract_strided_slice %93 {offsets = [0, 96], sizes = [2, 32], strides = [1, 1]} : vector<2x128xf32> to vector<2x32xf32>
    %98 = arith.mulf %95, %81 : vector<2x32xf32>
    %99 = arith.mulf %94, %96 : vector<2x32xf32>
    %100 = arith.addf %98, %99 : vector<2x32xf32>
    %101 = math.tanh %100 : vector<2x32xf32>
    %102 = arith.mulf %97, %101 : vector<2x32xf32>
    %103 = vector.extract_strided_slice %22 {offsets = [8, 0], sizes = [2, 128], strides = [1, 1]} : vector<16x128xf32> to vector<2x128xf32>
    %cst_27 = arith.constant dense<0.000000e+00> : vector<2x128xf32>
    %104 = tpu.matmul %102, %15, %cst_27 {dimension_numbers = #tpu.dot_dimension_numbers<[1], [0], [0], [1], [0, 0, 1, 1], [], []>} : vector<2x32xf32>, vector<32x128xf32>, vector<2x128xf32> -> vector<2x128xf32>
    %105 = arith.addf %103, %104 : vector<2x128xf32>
    %106 = math.tanh %105 : vector<2x128xf32>
    %107 = arith.negf %105 : vector<2x128xf32>
    %108 = math.exp %107 : vector<2x128xf32>
    %cst_28 = arith.constant 1.000000e+00 : f32
    %109 = vector.broadcast %cst_28 : f32 to vector<2x128xf32>
    %110 = arith.addf %109, %108 : vector<2x128xf32>
    %111 = arith.divf %109, %110 : vector<2x128xf32>
    %112 = arith.select %13, %106, %111 : vector<2x128xi1>, vector<2x128xf32>
    %113 = vector.extract_strided_slice %112 {offsets = [0, 0], sizes = [2, 32], strides = [1, 1]} : vector<2x128xf32> to vector<2x32xf32>
    %114 = vector.extract_strided_slice %112 {offsets = [0, 32], sizes = [2, 32], strides = [1, 1]} : vector<2x128xf32> to vector<2x32xf32>
    %115 = vector.extract_strided_slice %112 {offsets = [0, 64], sizes = [2, 32], strides = [1, 1]} : vector<2x128xf32> to vector<2x32xf32>
    %116 = vector.extract_strided_slice %112 {offsets = [0, 96], sizes = [2, 32], strides = [1, 1]} : vector<2x128xf32> to vector<2x32xf32>
    %117 = arith.mulf %114, %100 : vector<2x32xf32>
    %118 = arith.mulf %113, %115 : vector<2x32xf32>
    %119 = arith.addf %117, %118 : vector<2x32xf32>
    %120 = math.tanh %119 : vector<2x32xf32>
    %121 = arith.mulf %116, %120 : vector<2x32xf32>
    %122 = vector.extract_strided_slice %22 {offsets = [10, 0], sizes = [2, 128], strides = [1, 1]} : vector<16x128xf32> to vector<2x128xf32>
    %cst_29 = arith.constant dense<0.000000e+00> : vector<2x128xf32>
    %123 = tpu.matmul %121, %15, %cst_29 {dimension_numbers = #tpu.dot_dimension_numbers<[1], [0], [0], [1], [0, 0, 1, 1], [], []>} : vector<2x32xf32>, vector<32x128xf32>, vector<2x128xf32> -> vector<2x128xf32>
    %124 = arith.addf %122, %123 : vector<2x128xf32>
    %125 = math.tanh %124 : vector<2x128xf32>
    %126 = arith.negf %124 : vector<2x128xf32>
    %127 = math.exp %126 : vector<2x128xf32>
    %cst_30 = arith.constant 1.000000e+00 : f32
    %128 = vector.broadcast %cst_30 : f32 to vector<2x128xf32>
    %129 = arith.addf %128, %127 : vector<2x128xf32>
    %130 = arith.divf %128, %129 : vector<2x128xf32>
    %131 = arith.select %13, %125, %130 : vector<2x128xi1>, vector<2x128xf32>
    %132 = vector.extract_strided_slice %131 {offsets = [0, 0], sizes = [2, 32], strides = [1, 1]} : vector<2x128xf32> to vector<2x32xf32>
    %133 = vector.extract_strided_slice %131 {offsets = [0, 32], sizes = [2, 32], strides = [1, 1]} : vector<2x128xf32> to vector<2x32xf32>
    %134 = vector.extract_strided_slice %131 {offsets = [0, 64], sizes = [2, 32], strides = [1, 1]} : vector<2x128xf32> to vector<2x32xf32>
    %135 = vector.extract_strided_slice %131 {offsets = [0, 96], sizes = [2, 32], strides = [1, 1]} : vector<2x128xf32> to vector<2x32xf32>
    %136 = arith.mulf %133, %119 : vector<2x32xf32>
    %137 = arith.mulf %132, %134 : vector<2x32xf32>
    %138 = arith.addf %136, %137 : vector<2x32xf32>
    %139 = math.tanh %138 : vector<2x32xf32>
    %140 = arith.mulf %135, %139 : vector<2x32xf32>
    %141 = vector.extract_strided_slice %22 {offsets = [12, 0], sizes = [2, 128], strides = [1, 1]} : vector<16x128xf32> to vector<2x128xf32>
    %cst_31 = arith.constant dense<0.000000e+00> : vector<2x128xf32>
    %142 = tpu.matmul %140, %15, %cst_31 {dimension_numbers = #tpu.dot_dimension_numbers<[1], [0], [0], [1], [0, 0, 1, 1], [], []>} : vector<2x32xf32>, vector<32x128xf32>, vector<2x128xf32> -> vector<2x128xf32>
    %143 = arith.addf %141, %142 : vector<2x128xf32>
    %144 = math.tanh %143 : vector<2x128xf32>
    %145 = arith.negf %143 : vector<2x128xf32>
    %146 = math.exp %145 : vector<2x128xf32>
    %cst_32 = arith.constant 1.000000e+00 : f32
    %147 = vector.broadcast %cst_32 : f32 to vector<2x128xf32>
    %148 = arith.addf %147, %146 : vector<2x128xf32>
    %149 = arith.divf %147, %148 : vector<2x128xf32>
    %150 = arith.select %13, %144, %149 : vector<2x128xi1>, vector<2x128xf32>
    %151 = vector.extract_strided_slice %150 {offsets = [0, 0], sizes = [2, 32], strides = [1, 1]} : vector<2x128xf32> to vector<2x32xf32>
    %152 = vector.extract_strided_slice %150 {offsets = [0, 32], sizes = [2, 32], strides = [1, 1]} : vector<2x128xf32> to vector<2x32xf32>
    %153 = vector.extract_strided_slice %150 {offsets = [0, 64], sizes = [2, 32], strides = [1, 1]} : vector<2x128xf32> to vector<2x32xf32>
    %154 = vector.extract_strided_slice %150 {offsets = [0, 96], sizes = [2, 32], strides = [1, 1]} : vector<2x128xf32> to vector<2x32xf32>
    %155 = arith.mulf %152, %138 : vector<2x32xf32>
    %156 = arith.mulf %151, %153 : vector<2x32xf32>
    %157 = arith.addf %155, %156 : vector<2x32xf32>
    %158 = math.tanh %157 : vector<2x32xf32>
    %159 = arith.mulf %154, %158 : vector<2x32xf32>
    %160 = vector.extract_strided_slice %22 {offsets = [14, 0], sizes = [2, 128], strides = [1, 1]} : vector<16x128xf32> to vector<2x128xf32>
    %cst_33 = arith.constant dense<0.000000e+00> : vector<2x128xf32>
    %161 = tpu.matmul %159, %15, %cst_33 {dimension_numbers = #tpu.dot_dimension_numbers<[1], [0], [0], [1], [0, 0, 1, 1], [], []>} : vector<2x32xf32>, vector<32x128xf32>, vector<2x128xf32> -> vector<2x128xf32>
    %162 = arith.addf %160, %161 : vector<2x128xf32>
    %163 = math.tanh %162 : vector<2x128xf32>
    %164 = arith.negf %162 : vector<2x128xf32>
    %165 = math.exp %164 : vector<2x128xf32>
    %cst_34 = arith.constant 1.000000e+00 : f32
    %166 = vector.broadcast %cst_34 : f32 to vector<2x128xf32>
    %167 = arith.addf %166, %165 : vector<2x128xf32>
    %168 = arith.divf %166, %167 : vector<2x128xf32>
    %169 = arith.select %13, %163, %168 : vector<2x128xi1>, vector<2x128xf32>
    %170 = vector.extract_strided_slice %169 {offsets = [0, 0], sizes = [2, 32], strides = [1, 1]} : vector<2x128xf32> to vector<2x32xf32>
    %171 = vector.extract_strided_slice %169 {offsets = [0, 32], sizes = [2, 32], strides = [1, 1]} : vector<2x128xf32> to vector<2x32xf32>
    %172 = vector.extract_strided_slice %169 {offsets = [0, 64], sizes = [2, 32], strides = [1, 1]} : vector<2x128xf32> to vector<2x32xf32>
    %173 = vector.extract_strided_slice %169 {offsets = [0, 96], sizes = [2, 32], strides = [1, 1]} : vector<2x128xf32> to vector<2x32xf32>
    %174 = arith.mulf %171, %157 : vector<2x32xf32>
    %175 = arith.mulf %170, %172 : vector<2x32xf32>
    %176 = arith.addf %174, %175 : vector<2x32xf32>
    %177 = math.tanh %176 : vector<2x32xf32>
    %178 = arith.mulf %173, %177 : vector<2x32xf32>
    %179 = tpu.concatenate %45, %64, %83, %102, %121, %140, %159, %178 in 0 : vector<2x32xf32>, vector<2x32xf32>, vector<2x32xf32>, vector<2x32xf32>, vector<2x32xf32>, vector<2x32xf32>, vector<2x32xf32>, vector<2x32xf32> -> vector<16x32xf32>
    %c0_35 = arith.constant 0 : index
    %c0_36 = arith.constant 0 : index
    %180 = vector.load %arg7[%c0_35, %c0_36] : memref<32x32xf32, #tpu.memory_space<vmem>>, vector<32x32xf32>
    %cst_37 = arith.constant dense<0.000000e+00> : vector<16x32xf32>
    %181 = tpu.matmul %179, %180, %cst_37 {dimension_numbers = #tpu.dot_dimension_numbers<[1], [0], [0], [1], [0, 0, 1, 1], [], []>} : vector<16x32xf32>, vector<32x32xf32>, vector<16x32xf32> -> vector<16x32xf32>
    %c0_38 = arith.constant 0 : index
    %c0_39 = arith.constant 0 : index
    %182 = vector.load %arg8[%c0_38, %c0_39] : memref<1x32xf32, #tpu.memory_space<vmem>>, vector<1x32xf32>
    %183 = vector.broadcast %182 : vector<1x32xf32> to vector<16x32xf32>
    %184 = arith.addf %181, %183 : vector<16x32xf32>
    %c1 = arith.constant 1 : index
    %c0_40 = arith.constant 0 : index
    %c0_41 = arith.constant 0 : index
    %185 = vector.load %arg3[%c1, %c0_40, %c0_41] : memref<2x32x128xf32, #tpu.memory_space<vmem>>, vector<1x32x128xf32>
    %186 = vector.shape_cast %185 : vector<1x32x128xf32> to vector<32x128xf32>
    %c1_42 = arith.constant 1 : index
    %c0_43 = arith.constant 0 : index
    %c0_44 = arith.constant 0 : index
    %187 = vector.load %arg2[%c1_42, %c0_43, %c0_44] : memref<2x32x128xf32, #tpu.memory_space<vmem>>, vector<1x32x128xf32>
    %188 = vector.shape_cast %187 : vector<1x32x128xf32> to vector<32x128xf32>
    %cst_45 = arith.constant dense<0.000000e+00> : vector<16x128xf32>
    %189 = tpu.matmul %184, %188, %cst_45 {dimension_numbers = #tpu.dot_dimension_numbers<[1], [0], [0], [1], [0, 0, 1, 1], [], []>} : vector<16x32xf32>, vector<32x128xf32>, vector<16x128xf32> -> vector<16x128xf32>
    %c1_46 = arith.constant 1 : index
    %c0_47 = arith.constant 0 : index
    %c0_48 = arith.constant 0 : index
    %190 = vector.load %arg4[%c1_46, %c0_47, %c0_48] : memref<2x1x128xf32, #tpu.memory_space<vmem>>, vector<1x1x128xf32>
    %191 = vector.shape_cast %190 : vector<1x1x128xf32> to vector<1x128xf32>
    %192 = vector.broadcast %191 : vector<1x128xf32> to vector<16x128xf32>
    %193 = arith.addf %189, %192 : vector<16x128xf32>
    %c1_49 = arith.constant 1 : index
    %c0_50 = arith.constant 0 : index
    %c0_51 = arith.constant 0 : index
    %194 = vector.load %arg5[%c1_49, %c0_50, %c0_51] : memref<2x2x32xf32, #tpu.memory_space<vmem>>, vector<1x2x32xf32>
    %195 = vector.shape_cast %194 : vector<1x2x32xf32> to vector<2x32xf32>
    %c1_52 = arith.constant 1 : index
    %c0_53 = arith.constant 0 : index
    %c0_54 = arith.constant 0 : index
    %196 = vector.load %arg6[%c1_52, %c0_53, %c0_54] : memref<2x2x32xf32, #tpu.memory_space<vmem>>, vector<1x2x32xf32>
    %197 = vector.shape_cast %196 : vector<1x2x32xf32> to vector<2x32xf32>
    %198 = vector.extract_strided_slice %193 {offsets = [0, 0], sizes = [2, 128], strides = [1, 1]} : vector<16x128xf32> to vector<2x128xf32>
    %cst_55 = arith.constant dense<0.000000e+00> : vector<2x128xf32>
    %199 = tpu.matmul %195, %186, %cst_55 {dimension_numbers = #tpu.dot_dimension_numbers<[1], [0], [0], [1], [0, 0, 1, 1], [], []>} : vector<2x32xf32>, vector<32x128xf32>, vector<2x128xf32> -> vector<2x128xf32>
    %200 = arith.addf %198, %199 : vector<2x128xf32>
    %201 = math.tanh %200 : vector<2x128xf32>
    %202 = arith.negf %200 : vector<2x128xf32>
    %203 = math.exp %202 : vector<2x128xf32>
    %cst_56 = arith.constant 1.000000e+00 : f32
    %204 = vector.broadcast %cst_56 : f32 to vector<2x128xf32>
    %205 = arith.addf %204, %203 : vector<2x128xf32>
    %206 = arith.divf %204, %205 : vector<2x128xf32>
    %207 = arith.select %13, %201, %206 : vector<2x128xi1>, vector<2x128xf32>
    %208 = vector.extract_strided_slice %207 {offsets = [0, 0], sizes = [2, 32], strides = [1, 1]} : vector<2x128xf32> to vector<2x32xf32>
    %209 = vector.extract_strided_slice %207 {offsets = [0, 32], sizes = [2, 32], strides = [1, 1]} : vector<2x128xf32> to vector<2x32xf32>
    %210 = vector.extract_strided_slice %207 {offsets = [0, 64], sizes = [2, 32], strides = [1, 1]} : vector<2x128xf32> to vector<2x32xf32>
    %211 = vector.extract_strided_slice %207 {offsets = [0, 96], sizes = [2, 32], strides = [1, 1]} : vector<2x128xf32> to vector<2x32xf32>
    %212 = arith.mulf %209, %197 : vector<2x32xf32>
    %213 = arith.mulf %208, %210 : vector<2x32xf32>
    %214 = arith.addf %212, %213 : vector<2x32xf32>
    %215 = math.tanh %214 : vector<2x32xf32>
    %216 = arith.mulf %211, %215 : vector<2x32xf32>
    %217 = vector.extract_strided_slice %193 {offsets = [2, 0], sizes = [2, 128], strides = [1, 1]} : vector<16x128xf32> to vector<2x128xf32>
    %cst_57 = arith.constant dense<0.000000e+00> : vector<2x128xf32>
    %218 = tpu.matmul %216, %186, %cst_57 {dimension_numbers = #tpu.dot_dimension_numbers<[1], [0], [0], [1], [0, 0, 1, 1], [], []>} : vector<2x32xf32>, vector<32x128xf32>, vector<2x128xf32> -> vector<2x128xf32>
    %219 = arith.addf %217, %218 : vector<2x128xf32>
    %220 = math.tanh %219 : vector<2x128xf32>
    %221 = arith.negf %219 : vector<2x128xf32>
    %222 = math.exp %221 : vector<2x128xf32>
    %cst_58 = arith.constant 1.000000e+00 : f32
    %223 = vector.broadcast %cst_58 : f32 to vector<2x128xf32>
    %224 = arith.addf %223, %222 : vector<2x128xf32>
    %225 = arith.divf %223, %224 : vector<2x128xf32>
    %226 = arith.select %13, %220, %225 : vector<2x128xi1>, vector<2x128xf32>
    %227 = vector.extract_strided_slice %226 {offsets = [0, 0], sizes = [2, 32], strides = [1, 1]} : vector<2x128xf32> to vector<2x32xf32>
    %228 = vector.extract_strided_slice %226 {offsets = [0, 32], sizes = [2, 32], strides = [1, 1]} : vector<2x128xf32> to vector<2x32xf32>
    %229 = vector.extract_strided_slice %226 {offsets = [0, 64], sizes = [2, 32], strides = [1, 1]} : vector<2x128xf32> to vector<2x32xf32>
    %230 = vector.extract_strided_slice %226 {offsets = [0, 96], sizes = [2, 32], strides = [1, 1]} : vector<2x128xf32> to vector<2x32xf32>
    %231 = arith.mulf %228, %214 : vector<2x32xf32>
    %232 = arith.mulf %227, %229 : vector<2x32xf32>
    %233 = arith.addf %231, %232 : vector<2x32xf32>
    %234 = math.tanh %233 : vector<2x32xf32>
    %235 = arith.mulf %230, %234 : vector<2x32xf32>
    %236 = vector.extract_strided_slice %193 {offsets = [4, 0], sizes = [2, 128], strides = [1, 1]} : vector<16x128xf32> to vector<2x128xf32>
    %cst_59 = arith.constant dense<0.000000e+00> : vector<2x128xf32>
    %237 = tpu.matmul %235, %186, %cst_59 {dimension_numbers = #tpu.dot_dimension_numbers<[1], [0], [0], [1], [0, 0, 1, 1], [], []>} : vector<2x32xf32>, vector<32x128xf32>, vector<2x128xf32> -> vector<2x128xf32>
    %238 = arith.addf %236, %237 : vector<2x128xf32>
    %239 = math.tanh %238 : vector<2x128xf32>
    %240 = arith.negf %238 : vector<2x128xf32>
    %241 = math.exp %240 : vector<2x128xf32>
    %cst_60 = arith.constant 1.000000e+00 : f32
    %242 = vector.broadcast %cst_60 : f32 to vector<2x128xf32>
    %243 = arith.addf %242, %241 : vector<2x128xf32>
    %244 = arith.divf %242, %243 : vector<2x128xf32>
    %245 = arith.select %13, %239, %244 : vector<2x128xi1>, vector<2x128xf32>
    %246 = vector.extract_strided_slice %245 {offsets = [0, 0], sizes = [2, 32], strides = [1, 1]} : vector<2x128xf32> to vector<2x32xf32>
    %247 = vector.extract_strided_slice %245 {offsets = [0, 32], sizes = [2, 32], strides = [1, 1]} : vector<2x128xf32> to vector<2x32xf32>
    %248 = vector.extract_strided_slice %245 {offsets = [0, 64], sizes = [2, 32], strides = [1, 1]} : vector<2x128xf32> to vector<2x32xf32>
    %249 = vector.extract_strided_slice %245 {offsets = [0, 96], sizes = [2, 32], strides = [1, 1]} : vector<2x128xf32> to vector<2x32xf32>
    %250 = arith.mulf %247, %233 : vector<2x32xf32>
    %251 = arith.mulf %246, %248 : vector<2x32xf32>
    %252 = arith.addf %250, %251 : vector<2x32xf32>
    %253 = math.tanh %252 : vector<2x32xf32>
    %254 = arith.mulf %249, %253 : vector<2x32xf32>
    %255 = vector.extract_strided_slice %193 {offsets = [6, 0], sizes = [2, 128], strides = [1, 1]} : vector<16x128xf32> to vector<2x128xf32>
    %cst_61 = arith.constant dense<0.000000e+00> : vector<2x128xf32>
    %256 = tpu.matmul %254, %186, %cst_61 {dimension_numbers = #tpu.dot_dimension_numbers<[1], [0], [0], [1], [0, 0, 1, 1], [], []>} : vector<2x32xf32>, vector<32x128xf32>, vector<2x128xf32> -> vector<2x128xf32>
    %257 = arith.addf %255, %256 : vector<2x128xf32>
    %258 = math.tanh %257 : vector<2x128xf32>
    %259 = arith.negf %257 : vector<2x128xf32>
    %260 = math.exp %259 : vector<2x128xf32>
    %cst_62 = arith.constant 1.000000e+00 : f32
    %261 = vector.broadcast %cst_62 : f32 to vector<2x128xf32>
    %262 = arith.addf %261, %260 : vector<2x128xf32>
    %263 = arith.divf %261, %262 : vector<2x128xf32>
    %264 = arith.select %13, %258, %263 : vector<2x128xi1>, vector<2x128xf32>
    %265 = vector.extract_strided_slice %264 {offsets = [0, 0], sizes = [2, 32], strides = [1, 1]} : vector<2x128xf32> to vector<2x32xf32>
    %266 = vector.extract_strided_slice %264 {offsets = [0, 32], sizes = [2, 32], strides = [1, 1]} : vector<2x128xf32> to vector<2x32xf32>
    %267 = vector.extract_strided_slice %264 {offsets = [0, 64], sizes = [2, 32], strides = [1, 1]} : vector<2x128xf32> to vector<2x32xf32>
    %268 = vector.extract_strided_slice %264 {offsets = [0, 96], sizes = [2, 32], strides = [1, 1]} : vector<2x128xf32> to vector<2x32xf32>
    %269 = arith.mulf %266, %252 : vector<2x32xf32>
    %270 = arith.mulf %265, %267 : vector<2x32xf32>
    %271 = arith.addf %269, %270 : vector<2x32xf32>
    %272 = math.tanh %271 : vector<2x32xf32>
    %273 = arith.mulf %268, %272 : vector<2x32xf32>
    %274 = vector.extract_strided_slice %193 {offsets = [8, 0], sizes = [2, 128], strides = [1, 1]} : vector<16x128xf32> to vector<2x128xf32>
    %cst_63 = arith.constant dense<0.000000e+00> : vector<2x128xf32>
    %275 = tpu.matmul %273, %186, %cst_63 {dimension_numbers = #tpu.dot_dimension_numbers<[1], [0], [0], [1], [0, 0, 1, 1], [], []>} : vector<2x32xf32>, vector<32x128xf32>, vector<2x128xf32> -> vector<2x128xf32>
    %276 = arith.addf %274, %275 : vector<2x128xf32>
    %277 = math.tanh %276 : vector<2x128xf32>
    %278 = arith.negf %276 : vector<2x128xf32>
    %279 = math.exp %278 : vector<2x128xf32>
    %cst_64 = arith.constant 1.000000e+00 : f32
    %280 = vector.broadcast %cst_64 : f32 to vector<2x128xf32>
    %281 = arith.addf %280, %279 : vector<2x128xf32>
    %282 = arith.divf %280, %281 : vector<2x128xf32>
    %283 = arith.select %13, %277, %282 : vector<2x128xi1>, vector<2x128xf32>
    %284 = vector.extract_strided_slice %283 {offsets = [0, 0], sizes = [2, 32], strides = [1, 1]} : vector<2x128xf32> to vector<2x32xf32>
    %285 = vector.extract_strided_slice %283 {offsets = [0, 32], sizes = [2, 32], strides = [1, 1]} : vector<2x128xf32> to vector<2x32xf32>
    %286 = vector.extract_strided_slice %283 {offsets = [0, 64], sizes = [2, 32], strides = [1, 1]} : vector<2x128xf32> to vector<2x32xf32>
    %287 = vector.extract_strided_slice %283 {offsets = [0, 96], sizes = [2, 32], strides = [1, 1]} : vector<2x128xf32> to vector<2x32xf32>
    %288 = arith.mulf %285, %271 : vector<2x32xf32>
    %289 = arith.mulf %284, %286 : vector<2x32xf32>
    %290 = arith.addf %288, %289 : vector<2x32xf32>
    %291 = math.tanh %290 : vector<2x32xf32>
    %292 = arith.mulf %287, %291 : vector<2x32xf32>
    %293 = vector.extract_strided_slice %193 {offsets = [10, 0], sizes = [2, 128], strides = [1, 1]} : vector<16x128xf32> to vector<2x128xf32>
    %cst_65 = arith.constant dense<0.000000e+00> : vector<2x128xf32>
    %294 = tpu.matmul %292, %186, %cst_65 {dimension_numbers = #tpu.dot_dimension_numbers<[1], [0], [0], [1], [0, 0, 1, 1], [], []>} : vector<2x32xf32>, vector<32x128xf32>, vector<2x128xf32> -> vector<2x128xf32>
    %295 = arith.addf %293, %294 : vector<2x128xf32>
    %296 = math.tanh %295 : vector<2x128xf32>
    %297 = arith.negf %295 : vector<2x128xf32>
    %298 = math.exp %297 : vector<2x128xf32>
    %cst_66 = arith.constant 1.000000e+00 : f32
    %299 = vector.broadcast %cst_66 : f32 to vector<2x128xf32>
    %300 = arith.addf %299, %298 : vector<2x128xf32>
    %301 = arith.divf %299, %300 : vector<2x128xf32>
    %302 = arith.select %13, %296, %301 : vector<2x128xi1>, vector<2x128xf32>
    %303 = vector.extract_strided_slice %302 {offsets = [0, 0], sizes = [2, 32], strides = [1, 1]} : vector<2x128xf32> to vector<2x32xf32>
    %304 = vector.extract_strided_slice %302 {offsets = [0, 32], sizes = [2, 32], strides = [1, 1]} : vector<2x128xf32> to vector<2x32xf32>
    %305 = vector.extract_strided_slice %302 {offsets = [0, 64], sizes = [2, 32], strides = [1, 1]} : vector<2x128xf32> to vector<2x32xf32>
    %306 = vector.extract_strided_slice %302 {offsets = [0, 96], sizes = [2, 32], strides = [1, 1]} : vector<2x128xf32> to vector<2x32xf32>
    %307 = arith.mulf %304, %290 : vector<2x32xf32>
    %308 = arith.mulf %303, %305 : vector<2x32xf32>
    %309 = arith.addf %307, %308 : vector<2x32xf32>
    %310 = math.tanh %309 : vector<2x32xf32>
    %311 = arith.mulf %306, %310 : vector<2x32xf32>
    %312 = vector.extract_strided_slice %193 {offsets = [12, 0], sizes = [2, 128], strides = [1, 1]} : vector<16x128xf32> to vector<2x128xf32>
    %cst_67 = arith.constant dense<0.000000e+00> : vector<2x128xf32>
    %313 = tpu.matmul %311, %186, %cst_67 {dimension_numbers = #tpu.dot_dimension_numbers<[1], [0], [0], [1], [0, 0, 1, 1], [], []>} : vector<2x32xf32>, vector<32x128xf32>, vector<2x128xf32> -> vector<2x128xf32>
    %314 = arith.addf %312, %313 : vector<2x128xf32>
    %315 = math.tanh %314 : vector<2x128xf32>
    %316 = arith.negf %314 : vector<2x128xf32>
    %317 = math.exp %316 : vector<2x128xf32>
    %cst_68 = arith.constant 1.000000e+00 : f32
    %318 = vector.broadcast %cst_68 : f32 to vector<2x128xf32>
    %319 = arith.addf %318, %317 : vector<2x128xf32>
    %320 = arith.divf %318, %319 : vector<2x128xf32>
    %321 = arith.select %13, %315, %320 : vector<2x128xi1>, vector<2x128xf32>
    %322 = vector.extract_strided_slice %321 {offsets = [0, 0], sizes = [2, 32], strides = [1, 1]} : vector<2x128xf32> to vector<2x32xf32>
    %323 = vector.extract_strided_slice %321 {offsets = [0, 32], sizes = [2, 32], strides = [1, 1]} : vector<2x128xf32> to vector<2x32xf32>
    %324 = vector.extract_strided_slice %321 {offsets = [0, 64], sizes = [2, 32], strides = [1, 1]} : vector<2x128xf32> to vector<2x32xf32>
    %325 = vector.extract_strided_slice %321 {offsets = [0, 96], sizes = [2, 32], strides = [1, 1]} : vector<2x128xf32> to vector<2x32xf32>
    %326 = arith.mulf %323, %309 : vector<2x32xf32>
    %327 = arith.mulf %322, %324 : vector<2x32xf32>
    %328 = arith.addf %326, %327 : vector<2x32xf32>
    %329 = math.tanh %328 : vector<2x32xf32>
    %330 = arith.mulf %325, %329 : vector<2x32xf32>
    %331 = vector.extract_strided_slice %193 {offsets = [14, 0], sizes = [2, 128], strides = [1, 1]} : vector<16x128xf32> to vector<2x128xf32>
    %cst_69 = arith.constant dense<0.000000e+00> : vector<2x128xf32>
    %332 = tpu.matmul %330, %186, %cst_69 {dimension_numbers = #tpu.dot_dimension_numbers<[1], [0], [0], [1], [0, 0, 1, 1], [], []>} : vector<2x32xf32>, vector<32x128xf32>, vector<2x128xf32> -> vector<2x128xf32>
    %333 = arith.addf %331, %332 : vector<2x128xf32>
    %334 = math.tanh %333 : vector<2x128xf32>
    %335 = arith.negf %333 : vector<2x128xf32>
    %336 = math.exp %335 : vector<2x128xf32>
    %cst_70 = arith.constant 1.000000e+00 : f32
    %337 = vector.broadcast %cst_70 : f32 to vector<2x128xf32>
    %338 = arith.addf %337, %336 : vector<2x128xf32>
    %339 = arith.divf %337, %338 : vector<2x128xf32>
    %340 = arith.select %13, %334, %339 : vector<2x128xi1>, vector<2x128xf32>
    %341 = vector.extract_strided_slice %340 {offsets = [0, 0], sizes = [2, 32], strides = [1, 1]} : vector<2x128xf32> to vector<2x32xf32>
    %342 = vector.extract_strided_slice %340 {offsets = [0, 32], sizes = [2, 32], strides = [1, 1]} : vector<2x128xf32> to vector<2x32xf32>
    %343 = vector.extract_strided_slice %340 {offsets = [0, 64], sizes = [2, 32], strides = [1, 1]} : vector<2x128xf32> to vector<2x32xf32>
    %344 = vector.extract_strided_slice %340 {offsets = [0, 96], sizes = [2, 32], strides = [1, 1]} : vector<2x128xf32> to vector<2x32xf32>
    %345 = arith.mulf %342, %328 : vector<2x32xf32>
    %346 = arith.mulf %341, %343 : vector<2x32xf32>
    %347 = arith.addf %345, %346 : vector<2x32xf32>
    %348 = math.tanh %347 : vector<2x32xf32>
    %349 = arith.mulf %344, %348 : vector<2x32xf32>
    %c0_71 = arith.constant 0 : index
    %c0_72 = arith.constant 0 : index
    %350 = vector.load %arg9[%c0_71, %c0_72] : memref<32x16xf32, #tpu.memory_space<vmem>>, vector<32x16xf32>
    %cst_73 = arith.constant dense<0.000000e+00> : vector<2x16xf32>
    %351 = tpu.matmul %349, %350, %cst_73 {dimension_numbers = #tpu.dot_dimension_numbers<[1], [0], [0], [1], [0, 0, 1, 1], [], []>} : vector<2x32xf32>, vector<32x16xf32>, vector<2x16xf32> -> vector<2x16xf32>
    %c0_74 = arith.constant 0 : index
    %c0_75 = arith.constant 0 : index
    %352 = vector.load %arg10[%c0_74, %c0_75] : memref<1x16xf32, #tpu.memory_space<vmem>>, vector<1x16xf32>
    %353 = vector.broadcast %352 : vector<1x16xf32> to vector<2x16xf32>
    %354 = arith.addf %351, %353 : vector<2x16xf32>
    %c0_76 = arith.constant 0 : index
    %c0_77 = arith.constant 0 : index
    %355 = vector.load %arg11[%c0_76, %c0_77] : memref<2x16xf32, #tpu.memory_space<vmem>>, vector<2x16xf32>
    tpu.vector_store %arg11[%c0_76, %c0_77], %354 {strides = array<i32>} : memref<2x16xf32, #tpu.memory_space<vmem>>, vector<2x16xf32>,
    return
  }
}

</mosaic_0001>

<bundles_post_ra>
// kernel: text_lstm_forward.1
= control target key start
LH: loop header
LB: loop body
LE: loop exit
PB: predicated region body
PF: predicated region fallthrough
CT: control target
= control target key end

     0   :  { %16 = vsyncpa [#allocation3], 0  ;;  %s3529_s0 = inlined_call_operand.vmem [shape: s32[16,1], index: 0, kind: input, shape index: {}]   ;;  %s3530_s1 = inlined_call_operand.vmem [shape: f32[16,32], index: 1, kind: input, shape index: {}]   ;;  %s3531_s2 = inlined_call_operand.vmem [shape: f32[2,32,128], index: 2, kind: input, shape index: {}]   ;;  %s3532_s3 = inlined_call_operand.hbm [shape: f32[2,32,128], index: 3, kind: input, shape index: {}]   ;;  %s3533_s4 = inlined_call_operand.vmem [shape: f32[2,1,128], index: 4, kind: input, shape index: {}]   ;;  %s3534_s5 = inlined_call_operand.vmem [shape: f32[2,2,32], index: 5, kind: input, shape index: {}]   ;;  %s3535_s6 = inlined_call_operand.hbm [shape: f32[2,2,32], index: 6, kind: input, shape index: {}]   ;;  %s3536_s7 = inlined_call_operand.vmem [shape: f32[32,32], index: 7, kind: input, shape index: {}]   ;;  %s3537_s8 = inlined_call_operand.vmem [shape: f32[1,32], index: 8, kind: input, shape index: {}]   ;;  %s3538_s9 = inlined_call_operand.vmem [shape: f32[32,16], index: 9, kind: input, shape index: {}]   ;;  %s3539_s10 = inlined_call_operand.hbm [shape: f32[1,16], index: 10, kind: input, shape index: {}]   ;;  %s3540_s11 = inlined_call_operand.hbm [shape: f32[2,16], index: 11, kind: output, shape index: {}]  }
   0x1   :  { %17 = vsyncpa [#allocation6], 0 }
   0x2   :  { %18 = vsyncpa [#allocation4], 0  ;;  %s3054_s17 = smov [#allocation5]   ;;  %s2960_s21 = scalar_lea.hbm %s3535_s6, 64 }
   0x3   :  { %s46_s18 = sshll.u32 %s3054_s17, 4  ;;  %p2961_p0 = scmp.ne.s32.totalorder %s3535_s6, %s2960_s21  ;;  %s47_s18 = int_to_ptr.vmem [resolvable:$true] %s46_s18 }
   0x4   :  { %p2964_p1 = scmp.lt.u32.totalorder %s2960_s21, %s3535_s6 }
   0x6   :  { %p2966_p2 = pnand %p2964_p1, %p2961_p0 }
   0x8   :  { %2969 = shalt.err (!%p2966_p2)
}
   0x9   :  { %s2970_s26 = scalar_lea.vmem %s47_s18, 64  ;;  %p2975_p4 = scmp.lt.s32.totalorder %s47_s18, %s47_s18 }
   0xa   :  { %p2971_p3 = scmp.ne.s32.totalorder %s47_s18, %s2970_s26  ;;  %p2976_p5 = scmp.lt.s32.totalorder %s2970_s26, %s2970_s26 }
   0xc   :  { %p2977_p6 = por %p2976_p5, %p2975_p4 }
   0xe   :  { %p2978_p7 = pnand %p2977_p6, %p2971_p3 }
  0x10   :  { %2981 = shalt.err (!%p2978_p7)
}
  0x11   :  { %s3055_s27 = smov 32   ;;  %s3056_s28 = smov 2  }
  0x12   :  { %52 = dma.hbm_to_vmem [thread:$0]  %s3535_s6, 64, %s47_s18, [#allocation6], %s3055_s27, %s3055_s27, %s3056_s28  }
  0x13   :  { %s3057_s12 = smov [#allocation2]   ;;  %s2982_s16 = scalar_lea.hbm %s3532_s3, 1024 }
  0x14   :  { %s30_s13 = sshll.u32 %s3057_s12, 4  ;;  %p2983_p8 = scmp.ne.s32.totalorder %s3532_s3, %s2982_s16  ;;  %s31_s13 = int_to_ptr.vmem [resolvable:$true] %s30_s13 }
  0x15   :  { %p2986_p9 = scmp.lt.u32.totalorder %s2982_s16, %s3532_s3 }
  0x17   :  { %p2988_p10 = pnand %p2986_p9, %p2983_p8 }
  0x19   :  { %2991 = shalt.err (!%p2988_p10)
}
  0x1a   :  { %s2992_s22 = scalar_lea.vmem %s31_s13, 1024  ;;  %p2997_p12 = scmp.lt.s32.totalorder %s31_s13, %s31_s13 }
  0x1b   :  { %p2993_p11 = scmp.ne.s32.totalorder %s31_s13, %s2992_s22  ;;  %p2998_p13 = scmp.lt.s32.totalorder %s2992_s22, %s2992_s22 }
  0x1d   :  { %p2999_p0 = por %p2998_p13, %p2997_p12 }
  0x1f   :  { %p3000_p1 = pnand %p2999_p0, %p2993_p11 }
  0x21   :  { %3003 = shalt.err (!%p3000_p1)
}
  0x22   :  { %s3058_s6 = smov 128   ;;  %s3059_s18 = smov 8  }
  0x23   :  { %36 = dma.hbm_to_vmem [thread:$0]  %s3532_s3, 1024, %s31_s13, [#allocation3], %s3058_s6, %s3058_s6, %s3059_s18  }
  0x24   :  { %s3060_s25 = smov [#allocation7]   ;;  %s3004_s30 = scalar_lea.hbm %s3539_s10, 16 }
  0x25   :  { %s65_s26 = sshll.u32 %s3060_s25, 4  ;;  %p3005_p2 = scmp.ne.s32.totalorder %s3539_s10, %s3004_s30  ;;  %s66_s26 = int_to_ptr.vmem [resolvable:$true] %s65_s26 }
  0x26   :  { %p3008_p3 = scmp.lt.u32.totalorder %s3004_s30, %s3539_s10 }
  0x28   :  { %p3010_p4 = pnand %p3008_p3, %p3005_p2 }
  0x2a   :  { %3013 = shalt.err (!%p3010_p4)
}
  0x2b   :  { %s3014_s17 = scalar_lea.vmem %s66_s26, 16  ;;  %s3018_s3 = scalar_lea.vmem %s66_s26, 32 }
  0x2c   :  { %p3015_p5 = scmp.ne.s32.totalorder %s66_s26, %s3014_s17  ;;  %p3019_p6 = scmp.lt.s32.totalorder %s66_s26, %s66_s26 }
  0x2d   :  { %p3020_p7 = scmp.lt.s32.totalorder %s3018_s3, %s3014_s17 }
  0x2f   :  { %p3021_p8 = por %p3020_p7, %p3019_p6 }
  0x31   :  { %p3022_p9 = pnand %p3021_p8, %p3015_p5 }
  0x33   :  { %3025 = shalt.err (!%p3022_p9)
}
  0x34   :  { %68 = dma.hbm_to_vmem [thread:$0]  %s3539_s10, 16, %s66_s26, [#allocation6]  }
  0x35   :  { %3048 = dma.done.wait [#allocation3], 1024  }
  0x36   :  { %3049 = vsyncadd [#allocation3], 4294966272 }
  0x37   :  { %3050 = dma.done.wait [#allocation6], 80  }
  0x38   :  { %3051 = vsyncadd [#allocation6], 4294967216  ;;  %v3061_v0 = vmov 0   ;;  %v78_v1 = vld [vmem:[%s3529_s0] sm:$0xff]  ;;  %v95_v3 = vld [vmem:[%s3530_s1 + $0x8] sm:$0xff]  ;;  %v3062_v9 = vmov 0.0|0.0   ;;  %v80_v13 = vlaneseq }
  0x39   :  { %2831 = vset.pattern.permute.xlu0 %v3061_v0  ;;  %v94_v2 = vld [vmem:[%s3530_s1] sm:$0xff]  ;;  %v79_v4 = vld [vmem:[%s3529_s0 + $0x8] sm:$0xff]  ;;  %v187_v10 = vld [vmem:[%s3531_s2 + $0x10] sm:$0xff]  ;;  %vm96_vm0 = vcmask 130048   ;;  %v3063_v18 = vmov 0.0   ;;  %vm196_vm3 = vcmask 261120  }
  0x3a   :  { %83 = vperm.xlu0 %2831, %v78_v1   ;;  %v2688_v5 = vpack.c.bf16 %v95_v3, %v94_v2  ;;  %v185_v6 = vld [vmem:[%s3531_s2] sm:$0xff]  ;;  %v186_v7 = vld [vmem:[%s3531_s2 + $0x8] sm:$0xff]  ;;  %v188_v11 = vld [vmem:[%s3531_s2 + $0x18] sm:$0xff]  ;;  %v81_v14 = vand.u32 127, %v80_v13  ;;  %vm3064_vm4 = vmmov 0   ;;  %s3065_s3 = smov 64  }
  0x3b   :  { %v2692_v8 = vpack.c.bf16 %v186_v7, %v185_v6  ;;  %v2696_v12 = vpack.c.bf16 %v188_v11, %v187_v10  ;;  %v181_v16 = vld [vmem:[#allocation2] sm:$0xff]  ;;  %v182_v17 = vld [vmem:[#allocation2 + $0x8] sm:$0xff]  ;;  %v183_v23 = vld [vmem:[#allocation2 + $0x10] sm:$0xff]  ;;  %vm1134_vm8 = vcmask 1041408   ;;  %vm1136_vm9 = vcmask 1043456   ;;  %s3066_s21 = smov [#allocation8]  }
  0x3c   :  { %2689 = vmatprep.subr.bf16.mxu0 %v2688_v5  ;;  %v3192_v21 = vpack.c.bf16 %v182_v17, %v181_v16  ;;  %v184_v24 = vld [vmem:[#allocation2 + $0x18] sm:$0xff]  ;;  %v278_v26 = vld [vmem:[%s3534_s5] sm:$0x3]  ;;  %vm178_vm5 = vcmp.ge.s32.totalorder %v81_v14, 64  ;;  %vm179_vm6 = vcmp.lt.s32.totalorder %v81_v14, 96  ;;  %vm1138_vm10 = vcmask 1045504  }
  0x3d   :  { %2691 = vmatpush3.bf16.msra.mxu0 %v2688_v5  ;;  %2693 = vmatprep.subr.bf16.mxu1 %v2692_v8  ;;  %v3197_v25 = vpack.c.bf16 %v184_v24, %v183_v23  ;;  %v2305_v31 = vld [vmem:[%s3533_s4] ss:$0 sm:$0xff]  ;;  %vm3229_vm7 = vmand %vm178_vm5, %vm179_vm6  ;;  %v2197_v40 = vld [vmem:[%s3538_s9 + $0x8] sm:$0xff]  ;;  %s2291_s22 = sshll.u32 %s3066_s21, 4  ;;  %vm2283_vm11 = vcmask 123904   ;;  %s2292_s22 = int_to_ptr.vmem [resolvable:$true] %s2291_s22 }
  0x3e   :  { %86 = vperm.xlu0 %2831, %v79_v4   ;;  %2700 = vmatprep.subr.bf16.mxu0 %v3062_v9  ;;  %v279_v44 = vld [vmem:[#allocation5] sm:$0x3]  ;;  %p3031_p11 = scmp.lt.s32.totalorder %s2292_s22, %s2292_s22 }
  0x3f   :  { %2695 = vmatpush3.bf16.msra.mxu1 %v2692_v8 }
  0x40   :  { %2697 = vmatprep.subr.bf16.mxu1 %v2696_v12 }
  0x43   :  { %2699 = vmatpush3.bf16.msra.mxu1 %v2696_v12 }
  0x44   :  { %2706 = vmatprep.subr.bf16.mxu1 %v3062_v9 }
  0xb9   :  { %v84_v15 = vpop.permute.xlu0 %83 }
  0xba   :  { %vm88_vm1 = vcmp.eq.s32.totalorder %v81_v14, %v84_v15 }
  0xbb   :  { %v2301_v19 = vsel %vm88_vm1, 1.0, %v3063_v18 }
  0xbc   :  { %2465 = vmatprep.mubr.msk.f32.mxu0 %vm96_vm0, %v2301_v19 }
  0xbd   :  { %v87_v20 = vpop.permute.xlu0 %86 }
  0xbe   :  { %vm89_vm2 = vcmp.eq.s32.totalorder %v81_v14, %v87_v20 }
  0xbf   :  { %v2302_v22 = vsel %vm89_vm2, 1.0, %v3063_v18 }
  0xc0   :  { %2466 = vmatmul.mubr.msk.f32.vlgmr.msra.gmra.mrb[0].mxu0 %vm96_vm0, %v2302_v22 }
  0xc1   :  { %2702 = vmatpush3.bf16.msra.mxu0 %v3192_v21  ;;  %2487 = vmatprep.mubr.msk.f32.mxu0 %vm3064_vm4, %v3063_v18 }
  0xc2   :  { %2703 = vmatprep.subr.bf16.mxu0 %v3062_v9 }
  0xc5   :  { %2705 = vmatpush3.bf16.msra.mxu0 %v3197_v25 }
  0xc6   :  { %2712 = vmatprep.subr.bf16.mxu0 %v3062_v9 }
  0xc8   :  { %2488 = vmatmul.mubr.msk.f32.vlgmr.msra.gmra.mrb[2].mxu0 %vm196_vm3, %v278_v26 }
  0xc9   :  { %2714 = vmatpush3.bf16.msra.mxu0 %v3192_v21  ;;  %2509 = vmatprep.mubr.msk.f32.mxu0 %vm3064_vm4, %v3063_v18 }
  0xca   :  { %2715 = vmatprep.subr.bf16.mxu0 %v3062_v9 }
  0xcd   :  { %2717 = vmatpush3.bf16.msra.mxu0 %v3197_v25 }
  0xce   :  { %2724 = vmatprep.subr.bf16.mxu0 %v3062_v9 }
 0x193   :  { %v2467_v27 = vpop.f32.mrb[0].mxu0 }
 0x194   :  { %v169_v28 = vpop.f32.mrb[1].mxu0 }
 0x195   :  { %2476 = vmatprep.mubr.msk.f32.mxu1 %vm196_vm3, %v169_v28 }
 0x196   :  { %2477 = vmatmul.mubr.msk.f32.vlgmr.msra.gmra.mrb[0].mxu1 %vm196_vm3, %v2467_v27 }
 0x197   :  { %2708 = vmatpush3.bf16.msra.mxu1 %v3192_v21  ;;  %2498 = vmatprep.mubr.msk.f32.mxu1 %vm3064_vm4, %v3063_v18 }
 0x198   :  { %2709 = vmatprep.subr.bf16.mxu1 %v3062_v9 }
 0x19b   :  { %2711 = vmatpush3.bf16.msra.mxu1 %v3197_v25  ;;  %v349_v29 = vpop.f32.mrb[2].mxu0 }
 0x19c   :  { %2718 = vmatprep.subr.bf16.mxu1 %v3062_v9  ;;  %v2489_v30 = vpop.f32.mrb[3].mxu0 }
 0x269   :  { %v2478_v32 = vpop.f32.mrb[0].mxu1 }
 0x26a   :  { %v3224_v33 = vadd.f32 %v2478_v32, %v2305_v31  ;;  %v269_v34 = vpop.f32.mrb[1].mxu1 }
 0x26b   :  { %v3226_v35 = vadd.f32 %v2305_v31, %v269_v34 }
 0x26d   :  { %v353_v36 = vadd.f32 %v349_v29, %v3226_v35 }
 0x26f   :  { %v2309_v37 = vmul.f32 -1.442695, %v353_v36 }
 0x271   :  { %2832 = vpow2.f32 %v2309_v37 }
 0x272   :  { %2834 = vtanh.f32 %v353_v36 }
 0x27b   :  { %v2833_v38 = vpop.eup %2832 }
 0x27c   :  { %v358_v39 = vadd.f32 1.0, %v2833_v38  ;;  %v2835_v41 = vpop.eup %2834 }
 0x27e   :  { %2836 = vrcp.f32 %v358_v39 }
 0x288   :  { %v2837_v42 = vpop.eup %2836 }
 0x289   :  { %v361_v43 = vsel %vm3229_vm7, %v2835_v41, %v2837_v42 }
 0x28a   :  { %368 = vrot.lane.b32.xlu1 %v361_v43, %s3065_s3 }
 0x28e   :  { %363 = vrot.lane.b32.xlu1 %v279_v44, %s3055_s27 }
 0x2fc   :  { %v369_v45 = vpop.permute.xlu1 %368 }
 0x2fd   :  { %v371_v46 = vmul.f32 %v369_v45, %v361_v43 }
 0x2ff   :  { %373 = vrot.lane.b32.xlu0 %v371_v46, %s3055_s27 }
 0x300   :  { %v364_v47 = vpop.permute.xlu1 %363 }
 0x301   :  { %v366_v48 = vmul.f32 %v364_v47, %v361_v43 }
 0x371   :  { %v374_v49 = vpop.permute.xlu0 %373 }
 0x372   :  { %v376_v50 = vadd.f32 %v374_v49, %v366_v48 }
 0x374   :  { %2838 = vtanh.f32 %v376_v50  ;;  %v471_v3 = vrot.slane %v376_v50, 6 }
 0x37e   :  { %v2839_v51 = vpop.eup %2838 }
 0x37f   :  { %379 = vrot.lane.b32.xlu1 %v2839_v51, %s3065_s3 }
 0x3f1   :  { %v380_v52 = vpop.permute.xlu1 %379 }
 0x3f2   :  { %v3239_v53 = vmul.f32 %v380_v52, %v361_v43 }
 0x3f4   :  { %384 = vrot.lane.b32.xlu0 %v3239_v53, %s3055_s27 }
 0x466   :  { %v385_v54 = vpop.permute.xlu0 %384 }
 0x467   :  { %2499 = vmatmul.mubr.msk.f32.vlgmr.msra.gmra.mrb[2].mxu1 %vm196_vm3, %v385_v54 }
 0x468   :  { %2720 = vmatpush3.bf16.msra.mxu1 %v3192_v21  ;;  %2520 = vmatprep.mubr.msk.f32.mxu1 %vm3064_vm4, %v3063_v18 }
 0x469   :  { %2721 = vmatprep.subr.bf16.mxu1 %v3062_v9 }
 0x46c   :  { %2723 = vmatpush3.bf16.msra.mxu1 %v3197_v25 }
 0x46d   :  { %2730 = vmatprep.subr.bf16.mxu1 %v3062_v9 }
 0x53a   :  { %v454_v55 = vpop.f32.mrb[2].mxu1 }
 0x53b   :  { %v459_v56 = vrot.slane %v454_v55, 6  ;;  %v2500_v57 = vpop.f32.mrb[3].mxu1 }
 0x53d   :  { %v461_v58 = vadd.f32 %v459_v56, %v3226_v35 }
 0x53f   :  { %v2311_v59 = vmul.f32 -1.442695, %v461_v58 }
 0x541   :  { %2840 = vpow2.f32 %v2311_v59 }
 0x542   :  { %2842 = vtanh.f32 %v461_v58 }
 0x54b   :  { %v2841_v60 = vpop.eup %2840 }
 0x54c   :  { %v466_v61 = vadd.f32 1.0, %v2841_v60  ;;  %v2843_v62 = vpop.eup %2842 }
 0x54e   :  { %2844 = vrcp.f32 %v466_v61 }
 0x558   :  { %v2845_v63 = vpop.eup %2844 }
 0x559   :  { %v469_v0 = vsel %vm3229_vm7, %v2843_v62, %v2845_v63 }
 0x55a   :  { %475 = vrot.lane.b32.xlu1 %v469_v0, %s3065_s3  ;;  %v473_v4 = vmul.f32 %v471_v3, %v469_v0 }
 0x5cc   :  { %v476_v1 = vpop.permute.xlu1 %475 }
 0x5cd   :  { %v478_v2 = vmul.f32 %v476_v1, %v469_v0 }
 0x5cf   :  { %480 = vrot.lane.b32.xlu0 %v478_v2, %s3055_s27 }
 0x641   :  { %v481_v5 = vpop.permute.xlu0 %480 }
 0x642   :  { %v483_v6 = vadd.f32 %v481_v5, %v473_v4 }
 0x644   :  { %2846 = vtanh.f32 %v483_v6  ;;  %v579_v28 = vrot.slane %v483_v6, 6 }
 0x64e   :  { %v2847_v7 = vpop.eup %2846 }
 0x64f   :  { %486 = vrot.lane.b32.xlu1 %v2847_v7, %s3065_s3 }
 0x6c1   :  { %v487_v8 = vpop.permute.xlu1 %486 }
 0x6c2   :  { %v489_v10 = vmul.f32 %v487_v8, %v469_v0 }
 0x6c4   :  { %v491_v11 = vrot.slane %v489_v10, 2  ;;  %v1135_v37 = vsel %vm1134_vm8, %v3239_v53, %v489_v10 }
 0x6c6   :  { %492 = vrot.lane.b32.xlu0 %v491_v11, %s3055_s27 }
 0x738   :  { %v493_v12 = vpop.permute.xlu0 %492 }
 0x739   :  { %2510 = vmatmul.mubr.msk.f32.vlgmr.msra.gmra.mrb[4].mxu0 %vm196_vm3, %v493_v12 }
 0x73a   :  { %2726 = vmatpush3.bf16.msra.mxu0 %v3192_v21  ;;  %2531 = vmatprep.mubr.msk.f32.mxu0 %vm3064_vm4, %v3063_v18 }
 0x73b   :  { %2727 = vmatprep.subr.bf16.mxu0 %v3062_v9 }
 0x73e   :  { %2729 = vmatpush3.bf16.msra.mxu0 %v3197_v25 }
 0x73f   :  { %2736 = vmatprep.subr.bf16.mxu0 %v3062_v9 }
 0x80c   :  { %v562_v13 = vpop.f32.mrb[4].mxu0 }
 0x80d   :  { %v567_v14 = vrot.slane %v562_v13, 4  ;;  %v2511_v15 = vpop.f32.mrb[5].mxu0 }
 0x80f   :  { %v569_v16 = vadd.f32 %v567_v14, %v3226_v35 }
 0x811   :  { %v2313_v17 = vmul.f32 -1.442695, %v569_v16 }
 0x813   :  { %2848 = vpow2.f32 %v2313_v17 }
 0x814   :  { %2850 = vtanh.f32 %v569_v16 }
 0x81d   :  { %v2849_v19 = vpop.eup %2848 }
 0x81e   :  { %v574_v20 = vadd.f32 1.0, %v2849_v19  ;;  %v2851_v22 = vpop.eup %2850 }
 0x820   :  { %2852 = vrcp.f32 %v574_v20 }
 0x82a   :  { %v2853_v23 = vpop.eup %2852 }
 0x82b   :  { %v577_v24 = vsel %vm3229_vm7, %v2851_v22, %v2853_v23 }
 0x82c   :  { %583 = vrot.lane.b32.xlu1 %v577_v24, %s3065_s3  ;;  %v581_v29 = vmul.f32 %v579_v28, %v577_v24 }
 0x89e   :  { %v584_v26 = vpop.permute.xlu1 %583 }
 0x89f   :  { %v586_v27 = vmul.f32 %v584_v26, %v577_v24 }
 0x8a1   :  { %588 = vrot.lane.b32.xlu0 %v586_v27, %s3055_s27 }
 0x913   :  { %v589_v30 = vpop.permute.xlu0 %588 }
 0x914   :  { %v591_v31 = vadd.f32 %v589_v30, %v581_v29 }
 0x916   :  { %2854 = vtanh.f32 %v591_v31  ;;  %v687_v54 = vrot.slane %v591_v31, 6 }
 0x920   :  { %v2855_v32 = vpop.eup %2854 }
 0x921   :  { %594 = vrot.lane.b32.xlu1 %v2855_v32, %s3065_s3 }
 0x993   :  { %v595_v34 = vpop.permute.xlu1 %594 }
 0x994   :  { %v597_v36 = vmul.f32 %v595_v34, %v577_v24 }
 0x996   :  { %v599_v38 = vrot.slane %v597_v36, 4  ;;  %v1137_v39 = vsel %vm1136_vm9, %v1135_v37, %v597_v36 }
 0x998   :  { %600 = vrot.lane.b32.xlu0 %v599_v38, %s3055_s27 }
 0xa0a   :  { %v601_v41 = vpop.permute.xlu0 %600 }
 0xa0b   :  { %2521 = vmatmul.mubr.msk.f32.vlgmr.msra.gmra.mrb[4].mxu1 %vm196_vm3, %v601_v41 }
 0xa0c   :  { %2732 = vmatpush3.bf16.msra.mxu1 %v3192_v21  ;;  %2542 = vmatprep.mubr.msk.f32.mxu1 %vm3064_vm4, %v3063_v18 }
 0xa0d   :  { %2733 = vmatprep.subr.bf16.mxu1 %v3062_v9 }
 0xa10   :  { %2735 = vmatpush3.bf16.msra.mxu1 %v3197_v25 }
 0xa11   :  { %2742 = vmatprep.subr.bf16.mxu1 %v3062_v9 }
 0xade   :  { %v670_v42 = vpop.f32.mrb[4].mxu1 }
 0xadf   :  { %v675_v43 = vrot.slane %v670_v42, 2  ;;  %v2522_v44 = vpop.f32.mrb[5].mxu1 }
 0xae1   :  { %v677_v45 = vadd.f32 %v675_v43, %v3226_v35 }
 0xae3   :  { %v2315_v46 = vmul.f32 -1.442695, %v677_v45 }
 0xae5   :  { %2856 = vpow2.f32 %v2315_v46 }
 0xae6   :  { %2858 = vtanh.f32 %v677_v45 }
 0xaef   :  { %v2857_v47 = vpop.eup %2856 }
 0xaf0   :  { %v682_v48 = vadd.f32 1.0, %v2857_v47  ;;  %v2859_v49 = vpop.eup %2858 }
 0xaf2   :  { %2860 = vrcp.f32 %v682_v48 }
 0xafc   :  { %v2861_v50 = vpop.eup %2860 }
 0xafd   :  { %v685_v51 = vsel %vm3229_vm7, %v2859_v49, %v2861_v50 }
 0xafe   :  { %691 = vrot.lane.b32.xlu1 %v685_v51, %s3065_s3  ;;  %v689_v55 = vmul.f32 %v687_v54, %v685_v51 }
 0xb70   :  { %v692_v52 = vpop.permute.xlu1 %691 }
 0xb71   :  { %v694_v53 = vmul.f32 %v692_v52, %v685_v51 }
 0xb73   :  { %696 = vrot.lane.b32.xlu0 %v694_v53, %s3055_s27 }
 0xbe5   :  { %v697_v35 = vpop.permute.xlu0 %696 }
 0xbe6   :  { %v699_v56 = vadd.f32 %v697_v35, %v689_v55 }
 0xbe8   :  { %2862 = vtanh.f32 %v699_v56  ;;  %v792_v11 = vrot.slane %v699_v56, 6 }
 0xbf2   :  { %v2863_v57 = vpop.eup %2862 }
 0xbf3   :  { %702 = vrot.lane.b32.xlu1 %v2863_v57, %s3065_s3 }
 0xc65   :  { %v703_v58 = vpop.permute.xlu1 %702 }
 0xc66   :  { %v705_v59 = vmul.f32 %v703_v58, %v685_v51 }
 0xc68   :  { %v707_v60 = vrot.slane %v705_v59, 6  ;;  %v3288_v61 = vsel %vm1138_vm10, %v1137_v39, %v705_v59 }
 0xc6a   :  { %708 = vrot.lane.b32.xlu0 %v707_v60, %s3055_s27 }
 0xcdc   :  { %v709_v62 = vpop.permute.xlu0 %708 }
 0xcdd   :  { %2532 = vmatmul.mubr.msk.f32.vlgmr.msra.gmra.mrb[6].mxu0 %vm196_vm3, %v709_v62 }
 0xcde   :  { %2738 = vmatpush3.bf16.msra.mxu0 %v3192_v21  ;;  %2553 = vmatprep.mubr.msk.f32.mxu0 %vm3064_vm4, %v3063_v18 }
 0xcdf   :  { %2739 = vmatprep.subr.bf16.mxu0 %v3062_v9 }
 0xce2   :  { %2741 = vmatpush3.bf16.msra.mxu0 %v3197_v25 }
 0xdb0   :  { %v778_v63 = vpop.f32.mrb[6].mxu0 }
 0xdb1   :  { %v782_v0 = vadd.f32 %v778_v63, %v3224_v33  ;;  %v2533_v1 = vpop.f32.mrb[7].mxu0 }
 0xdb3   :  { %v2317_v2 = vmul.f32 -1.442695, %v782_v0 }
 0xdb5   :  { %2864 = vpow2.f32 %v2317_v2 }
 0xdb6   :  { %2866 = vtanh.f32 %v782_v0 }
 0xdbf   :  { %v2865_v3 = vpop.eup %2864 }
 0xdc0   :  { %v787_v4 = vadd.f32 1.0, %v2865_v3  ;;  %v2867_v5 = vpop.eup %2866 }
 0xdc2   :  { %2868 = vrcp.f32 %v787_v4 }
 0xdcc   :  { %v2869_v6 = vpop.eup %2868 }
 0xdcd   :  { %v790_v7 = vsel %vm3229_vm7, %v2867_v5, %v2869_v6 }
 0xdce   :  { %796 = vrot.lane.b32.xlu1 %v790_v7, %s3065_s3  ;;  %v794_v12 = vmul.f32 %v792_v11, %v790_v7 }
 0xe40   :  { %v797_v8 = vpop.permute.xlu1 %796 }
 0xe41   :  { %v799_v10 = vmul.f32 %v797_v8, %v790_v7 }
 0xe43   :  { %801 = vrot.lane.b32.xlu0 %v799_v10, %s3055_s27 }
 0xeb5   :  { %v802_v13 = vpop.permute.xlu0 %801 }
 0xeb6   :  { %v804_v14 = vadd.f32 %v802_v13, %v794_v12 }
 0xeb8   :  { %2870 = vtanh.f32 %v804_v14  ;;  %v899_v32 = vrot.slane %v804_v14, 6 }
 0xec2   :  { %v2871_v15 = vpop.eup %2870 }
 0xec3   :  { %807 = vrot.lane.b32.xlu1 %v2871_v15, %s3065_s3 }
 0xf35   :  { %v808_v16 = vpop.permute.xlu1 %807 }
 0xf36   :  { %v3303_v17 = vmul.f32 %v808_v16, %v790_v7 }
 0xf38   :  { %812 = vrot.lane.b32.xlu0 %v3303_v17, %s3055_s27 }
 0xfaa   :  { %v813_v19 = vpop.permute.xlu0 %812 }
 0xfab   :  { %2543 = vmatmul.mubr.msk.f32.vlgmr.msra.gmra.mrb[6].mxu1 %vm196_vm3, %v813_v19 }
 0xfac   :  { %2744 = vmatpush3.bf16.msra.mxu1 %v3192_v21  ;;  %2564 = vmatprep.mubr.msk.f32.mxu1 %vm3064_vm4, %v3063_v18 }
 0xfad   :  { %2745 = vmatprep.subr.bf16.mxu1 %v3062_v9 }
 0xfb0   :  { %2747 = vmatpush3.bf16.msra.mxu1 %v3197_v25 }
0x107e   :  { %v882_v20 = vpop.f32.mrb[6].mxu1 }
0x107f   :  { %v887_v22 = vrot.slane %v882_v20, 6  ;;  %v2544_v23 = vpop.f32.mrb[7].mxu1 }
0x1080   :  { %v1144_v23 = vld [vmem:[%s3536_s7 + $0x8] sm:$0xff] }
0x1081   :  { %v889_v24 = vadd.f32 %v887_v22, %v3224_v33  ;;  %v1143_v22 = vld [vmem:[%s3536_s7] sm:$0xff] }
0x1083   :  { %v2319_v26 = vmul.f32 -1.442695, %v889_v24 }
0x1085   :  { %2872 = vpow2.f32 %v2319_v26  ;;  %v1146_v26 = vld [vmem:[%s3536_s7 + $0x18] sm:$0xff] }
0x1086   :  { %2874 = vtanh.f32 %v889_v24  ;;  %v1145_v24 = vld [vmem:[%s3536_s7 + $0x10] sm:$0xff] }
0x108f   :  { %v2873_v27 = vpop.eup %2872 }
0x1090   :  { %v894_v28 = vadd.f32 1.0, %v2873_v27  ;;  %v2875_v29 = vpop.eup %2874  ;;  %v2752_v27 = vpack.c.bf16 %v1146_v26, %v1145_v24 }
0x1092   :  { %2876 = vrcp.f32 %v894_v28 }
0x109c   :  { %v2877_v21 = vpop.eup %2876 }
0x109d   :  { %v897_v30 = vsel %vm3229_vm7, %v2875_v29, %v2877_v21  ;;  %v2327_v29 = vld [vmem:[%s3531_s2 + $0x20] sm:$0xff]  ;;  %v2328_v21 = vld [vmem:[%s3531_s2 + $0x28] sm:$0xff] }
0x109e   :  { %903 = vrot.lane.b32.xlu1 %v897_v30, %s3065_s3  ;;  %v901_v34 = vmul.f32 %v899_v32, %v897_v30 }
0x1110   :  { %v904_v31 = vpop.permute.xlu1 %903 }
0x1111   :  { %v906_v25 = vmul.f32 %v904_v31, %v897_v30 }
0x1113   :  { %908 = vrot.lane.b32.xlu0 %v906_v25, %s3055_s27 }
0x1185   :  { %v909_v36 = vpop.permute.xlu0 %908 }
0x1186   :  { %v911_v37 = vadd.f32 %v909_v36, %v901_v34  ;;  %v1240_v36 = vld [vmem:[#allocation2 + $0x20] sm:$0xff] }
0x1188   :  { %2878 = vtanh.f32 %v911_v37  ;;  %v1007_v35 = vrot.slane %v911_v37, 6  ;;  %v1241_v37 = vld [vmem:[#allocation2 + $0x28] sm:$0xff] }
0x1192   :  { %v2879_v38 = vpop.eup %2878 }
0x1193   :  { %914 = vrot.lane.b32.xlu1 %v2879_v38, %s3065_s3  ;;  %v3365_v38 = vpack.c.bf16 %v1241_v37, %v1240_v36 }
0x1205   :  { %v915_v39 = vpop.permute.xlu1 %914 }
0x1206   :  { %v917_v41 = vmul.f32 %v915_v39, %v897_v30  ;;  %v2756_v30 = vpack.c.bf16 %v2328_v21, %v2327_v29  ;;  %v2329_v39 = vld [vmem:[%s3531_s2 + $0x30] sm:$0xff] }
0x1208   :  { %v919_v42 = vrot.slane %v917_v41, 2  ;;  %v1140_v63 = vsel %vm1134_vm8, %v3303_v17, %v917_v41  ;;  %2757 = vmatprep.subr.bf16.mxu1 %v2756_v30  ;;  %v2330_v41 = vld [vmem:[%s3531_s2 + $0x38] sm:$0xff] }
0x120a   :  { %920 = vrot.lane.b32.xlu0 %v919_v42, %s3055_s27  ;;  %v2760_v42 = vpack.c.bf16 %v2330_v41, %v2329_v39 }
0x127c   :  { %v921_v43 = vpop.permute.xlu0 %920 }
0x127d   :  { %2554 = vmatmul.mubr.msk.f32.vlgmr.msra.gmra.mrb[8].mxu0 %vm196_vm3, %v921_v43  ;;  %v1242_v43 = vld [vmem:[#allocation2 + $0x30] sm:$0xff] }
0x1350   :  { %v990_v44 = vpop.f32.mrb[8].mxu0 }
0x1351   :  { %v995_v45 = vrot.slane %v990_v44, 4  ;;  %v2555_v46 = vpop.f32.mrb[9].mxu0  ;;  %v1243_v44 = vld [vmem:[#allocation2 + $0x38] sm:$0xff] }
0x1352   :  { %v2335_v46 = vld [vmem:[%s3534_s5 + $0x2] sm:$0x3] }
0x1353   :  { %v997_v47 = vadd.f32 %v995_v45, %v3224_v33  ;;  %v3375_v45 = vpack.c.bf16 %v1243_v44, %v1242_v43 }
0x1355   :  { %v2321_v48 = vmul.f32 -1.442695, %v997_v47 }
0x1357   :  { %2880 = vpow2.f32 %v2321_v48  ;;  %v2324_v48 = vld [vmem:[%s3537_s8] ss:$0 sm:$0xff] }
0x1358   :  { %2882 = vtanh.f32 %v997_v47  ;;  %v1341_v47 = vld [vmem:[#allocation5 + $0x2] sm:$0x3] }
0x1361   :  { %v2881_v49 = vpop.eup %2880 }
0x1362   :  { %v1002_v50 = vadd.f32 1.0, %v2881_v49  ;;  %v2883_v51 = vpop.eup %2882 }
0x1364   :  { %2884 = vrcp.f32 %v1002_v50 }
0x136e   :  { %v2885_v52 = vpop.eup %2884 }
0x136f   :  { %v1005_v53 = vsel %vm3229_vm7, %v2883_v51, %v2885_v52 }
0x1370   :  { %1011 = vrot.lane.b32.xlu1 %v1005_v53, %s3065_s3  ;;  %v1009_v56 = vmul.f32 %v1007_v35, %v1005_v53 }
0x13e2   :  { %v1012_v54 = vpop.permute.xlu1 %1011 }
0x13e3   :  { %v1014_v55 = vmul.f32 %v1012_v54, %v1005_v53 }
0x13e5   :  { %1016 = vrot.lane.b32.xlu0 %v1014_v55, %s3055_s27  ;;  %v2332_v55 = vld [vmem:[%s3533_s4 + $0x1] ss:$0 sm:$0xff] }
0x1457   :  { %v1017_v57 = vpop.permute.xlu0 %1016 }
0x1458   :  { %v1019_v58 = vadd.f32 %v1017_v57, %v1009_v56 }
0x145a   :  { %2886 = vtanh.f32 %v1019_v58 }
0x1464   :  { %v2887_v59 = vpop.eup %2886 }
0x1465   :  { %1022 = vrot.lane.b32.xlu1 %v2887_v59, %s3065_s3 }
0x14d7   :  { %v1023_v60 = vpop.permute.xlu1 %1022 }
0x14d8   :  { %v1025_v62 = vmul.f32 %v1023_v60, %v1005_v53 }
0x14da   :  { %v1027_v0 = vrot.slane %v1025_v62, 4  ;;  %v1141_v1 = vsel %vm1136_vm9, %v1140_v63, %v1025_v62 }
0x14dc   :  { %1028 = vrot.lane.b32.xlu0 %v1027_v0, %s3055_s27 }
0x154e   :  { %v1029_v2 = vpop.permute.xlu0 %1028 }
0x154f   :  { %2565 = vmatmul.mubr.msk.f32.vlgmr.msra.gmra.mrb[8].mxu1 %vm196_vm3, %v1029_v2 }
0x1550   :  { %2759 = vmatpush3.bf16.msra.mxu1 %v2756_v30 }
0x1551   :  { %2761 = vmatprep.subr.bf16.mxu1 %v2760_v42 }
0x1554   :  { %2763 = vmatpush3.bf16.msra.mxu1 %v2760_v42 }
0x1555   :  { %2770 = vmatprep.subr.bf16.mxu1 %v3062_v9 }
0x1622   :  { %v1098_v3 = vpop.f32.mrb[8].mxu1 }
0x1623   :  { %v1103_v4 = vrot.slane %v1098_v3, 2  ;;  %v2566_v5 = vpop.f32.mrb[9].mxu1 }
0x1625   :  { %v1105_v6 = vadd.f32 %v1103_v4, %v3224_v33  ;;  %v1115_v33 = vrot.slane %v1019_v58, 6 }
0x1627   :  { %v2323_v7 = vmul.f32 -1.442695, %v1105_v6 }
0x1629   :  { %2888 = vpow2.f32 %v2323_v7 }
0x162a   :  { %2890 = vtanh.f32 %v1105_v6 }
0x1633   :  { %v2889_v8 = vpop.eup %2888 }
0x1634   :  { %v1110_v10 = vadd.f32 1.0, %v2889_v8  ;;  %v2891_v11 = vpop.eup %2890 }
0x1636   :  { %2892 = vrcp.f32 %v1110_v10 }
0x1640   :  { %v2893_v12 = vpop.eup %2892 }
0x1641   :  { %v1113_v13 = vsel %vm3229_vm7, %v2891_v11, %v2893_v12 }
0x1642   :  { %1119 = vrot.lane.b32.xlu1 %v1113_v13, %s3065_s3  ;;  %v1117_v16 = vmul.f32 %v1115_v33, %v1113_v13 }
0x16b4   :  { %v1120_v14 = vpop.permute.xlu1 %1119 }
0x16b5   :  { %v1122_v15 = vmul.f32 %v1120_v14, %v1113_v13 }
0x16b7   :  { %1124 = vrot.lane.b32.xlu0 %v1122_v15, %s3055_s27 }
0x16bb   :  { %1156 = vrot.lane.b32.xlu0 %v3288_v61, %s3055_s27  ;;  %v2748_v61 = vpack.c.bf16 %v1144_v23, %v1143_v22 }
0x16bd   :  { %2749 = vmatprep.subr.bf16.mxu0 %v2748_v61 }
0x16be   :  { %2751 = vmatpush3.bf16.msra.mxu0 %v2748_v61 }
0x16bf   :  { %2753 = vmatprep.subr.bf16.mxu0 %v2752_v27 }
0x16c2   :  { %2755 = vmatpush3.bf16.msra.mxu0 %v2752_v27 }
0x16c3   :  { %2764 = vmatprep.subr.bf16.mxu0 %v3062_v9 }
0x1729   :  { %v1125_v17 = vpop.permute.xlu0 %1124 }
0x172a   :  { %v1127_v19 = vadd.f32 %v1125_v17, %v1117_v16 }
0x172c   :  { %2894 = vtanh.f32 %v1127_v19 }
0x172d   :  { %v1157_v20 = vpop.permute.xlu0 %1156 }
0x172e   :  { %2575 = vmatprep.mubr.msk.f32.mxu0 %vm196_vm3, %v1157_v20 }
0x1736   :  { %v2895_v28 = vpop.eup %2894 }
0x1737   :  { %1130 = vrot.lane.b32.xlu1 %v2895_v28, %s3065_s3 }
0x17a9   :  { %v1131_v31 = vpop.permute.xlu1 %1130 }
0x17aa   :  { %v1133_v25 = vmul.f32 %v1131_v31, %v1113_v13 }
0x17ac   :  { %v1142_v32 = vsel %vm1138_vm10, %v1141_v1, %v1133_v25 }
0x17ad   :  { %1158 = vrot.lane.b32.xlu1 %v1142_v32, %s3055_s27 }
0x17b1   :  { %1425 = vrot.lane.b32.xlu1 %v1341_v47, %s3055_s27 }
0x181f   :  { %v1159_v34 = vpop.permute.xlu1 %1158 }
0x1820   :  { %2576 = vmatmul.mubr.msk.f32.vlgmr.msra.gmra.mrb[10].mxu0 %vm196_vm3, %v1159_v34 }
0x1821   :  { %2597 = vmatprep.mubr.msk.f32.mxu0 %vm3064_vm4, %v3063_v18  ;;  %2766 = vmatpush3.bf16.msra.mxu0 %v3365_v38 }
0x1822   :  { %2767 = vmatprep.subr.bf16.mxu0 %v3062_v9 }
0x1823   :  { %v1426_v5 = vpop.permute.xlu1 %1425 }
0x1825   :  { %2769 = vmatpush3.bf16.msra.mxu0 %v3375_v45 }
0x1826   :  { %2776 = vmatprep.subr.bf16.mxu0 %v3062_v9 }
0x1828   :  { %2598 = vmatmul.mubr.msk.f32.vlgmr.msra.gmra.mrb[12].mxu0 %vm196_vm3, %v2335_v46 }
0x1829   :  { %2778 = vmatpush3.bf16.msra.mxu0 %v3365_v38  ;;  %2619 = vmatprep.mubr.msk.f32.mxu0 %vm3064_vm4, %v3063_v18 }
0x182a   :  { %2779 = vmatprep.subr.bf16.mxu0 %v3062_v9 }
0x182d   :  { %2781 = vmatpush3.bf16.msra.mxu0 %v3375_v45 }
0x182e   :  { %2788 = vmatprep.subr.bf16.mxu0 %v3062_v9 }
0x18f3   :  { %v2577_v49 = vpop.f32.mrb[10].mxu0 }
0x18f4   :  { %v1230_v50 = vpop.f32.mrb[11].mxu0  ;;  %v1236_v52 = vadd.f32 %v2577_v49, %v2324_v48 }
0x18f5   :  { %v1231_v51 = vadd.f32 %v2324_v48, %v1230_v50 }
0x18f7   :  { %2586 = vmatprep.mubr.msk.f32.mxu1 %vm196_vm3, %v1231_v51 }
0x18f8   :  { %2587 = vmatmul.mubr.msk.f32.vlgmr.msra.gmra.mrb[10].mxu1 %vm196_vm3, %v1236_v52 }
0x18f9   :  { %2772 = vmatpush3.bf16.msra.mxu1 %v3365_v38  ;;  %2608 = vmatprep.mubr.msk.f32.mxu1 %vm3064_vm4, %v3063_v18 }
0x18fa   :  { %2773 = vmatprep.subr.bf16.mxu1 %v3062_v9 }
0x18fb   :  { %v1411_v53 = vpop.f32.mrb[12].mxu0 }
0x18fc   :  { %v2599_v54 = vpop.f32.mrb[13].mxu0 }
0x18fd   :  { %2775 = vmatpush3.bf16.msra.mxu1 %v3375_v45 }
0x18fe   :  { %2782 = vmatprep.subr.bf16.mxu1 %v3062_v9 }
0x19cb   :  { %v2588_v35 = vpop.f32.mrb[10].mxu1 }
0x19cc   :  { %v3405_v56 = vadd.f32 %v2588_v35, %v2332_v55  ;;  %v1329_v57 = vpop.f32.mrb[11].mxu1 }
0x19cd   :  { %v3407_v58 = vadd.f32 %v2332_v55, %v1329_v57 }
0x19cf   :  { %v1415_v59 = vadd.f32 %v1411_v53, %v3407_v58 }
0x19d1   :  { %v2337_v60 = vmul.f32 -1.442695, %v1415_v59 }
0x19d3   :  { %2896 = vpow2.f32 %v2337_v60 }
0x19d4   :  { %2898 = vtanh.f32 %v1415_v59 }
0x19dd   :  { %v2897_v62 = vpop.eup %2896 }
0x19de   :  { %v1420_v63 = vadd.f32 1.0, %v2897_v62  ;;  %v2899_v0 = vpop.eup %2898 }
0x19e0   :  { %2900 = vrcp.f32 %v1420_v63 }
0x19ea   :  { %v2901_v1 = vpop.eup %2900 }
0x19eb   :  { %v1423_v2 = vsel %vm3229_vm7, %v2899_v0, %v2901_v1 }
0x19ec   :  { %1430 = vrot.lane.b32.xlu0 %v1423_v2, %s3065_s3  ;;  %v1428_v6 = vmul.f32 %v1426_v5, %v1423_v2 }
0x1a5e   :  { %v1431_v3 = vpop.permute.xlu0 %1430 }
0x1a5f   :  { %v1433_v4 = vmul.f32 %v1431_v3, %v1423_v2 }
0x1a61   :  { %1435 = vrot.lane.b32.xlu0 %v1433_v4, %s3055_s27 }
0x1ad3   :  { %v1436_v7 = vpop.permute.xlu0 %1435 }
0x1ad4   :  { %v1438_v8 = vadd.f32 %v1436_v7, %v1428_v6 }
0x1ad6   :  { %2902 = vtanh.f32 %v1438_v8  ;;  %v1533_v27 = vrot.slane %v1438_v8, 6 }
0x1ae0   :  { %v2903_v10 = vpop.eup %2902 }
0x1ae1   :  { %1441 = vrot.lane.b32.xlu1 %v2903_v10, %s3065_s3 }
0x1b53   :  { %v1442_v11 = vpop.permute.xlu1 %1441 }
0x1b54   :  { %v1444_v12 = vmul.f32 %v1442_v11, %v1423_v2 }
0x1b56   :  { %1446 = vrot.lane.b32.xlu0 %v1444_v12, %s3055_s27 }
0x1bc8   :  { %v1447_v13 = vpop.permute.xlu0 %1446 }
0x1bc9   :  { %2609 = vmatmul.mubr.msk.f32.vlgmr.msra.gmra.mrb[12].mxu1 %vm196_vm3, %v1447_v13 }
0x1bca   :  { %2784 = vmatpush3.bf16.msra.mxu1 %v3365_v38  ;;  %2630 = vmatprep.mubr.msk.f32.mxu1 %vm3064_vm4, %v3063_v18 }
0x1bcb   :  { %2785 = vmatprep.subr.bf16.mxu1 %v3062_v9 }
0x1bce   :  { %2787 = vmatpush3.bf16.msra.mxu1 %v3375_v45 }
0x1bcf   :  { %2794 = vmatprep.subr.bf16.mxu1 %v3062_v9 }
0x1c9c   :  { %v1516_v14 = vpop.f32.mrb[12].mxu1 }
0x1c9d   :  { %v1521_v15 = vrot.slane %v1516_v14, 6  ;;  %v2610_v33 = vpop.f32.mrb[13].mxu1 }
0x1c9f   :  { %v1523_v16 = vadd.f32 %v1521_v15, %v3407_v58 }
0x1ca1   :  { %v2339_v17 = vmul.f32 -1.442695, %v1523_v16 }
0x1ca3   :  { %2904 = vpow2.f32 %v2339_v17 }
0x1ca4   :  { %2906 = vtanh.f32 %v1523_v16 }
0x1cad   :  { %v2905_v19 = vpop.eup %2904 }
0x1cae   :  { %v1528_v20 = vadd.f32 1.0, %v2905_v19  ;;  %v2907_v22 = vpop.eup %2906 }
0x1cb0   :  { %2908 = vrcp.f32 %v1528_v20 }
0x1cba   :  { %v2909_v23 = vpop.eup %2908 }
0x1cbb   :  { %v1531_v24 = vsel %vm3229_vm7, %v2907_v22, %v2909_v23 }
0x1cbc   :  { %1537 = vrot.lane.b32.xlu1 %v1531_v24, %s3065_s3  ;;  %v1535_v28 = vmul.f32 %v1533_v27, %v1531_v24 }
0x1d2e   :  { %v1538_v61 = vpop.permute.xlu1 %1537 }
0x1d2f   :  { %v1540_v26 = vmul.f32 %v1538_v61, %v1531_v24 }
0x1d31   :  { %1542 = vrot.lane.b32.xlu0 %v1540_v26, %s3055_s27 }
0x1da3   :  { %v1543_v29 = vpop.permute.xlu0 %1542 }
0x1da4   :  { %v1545_v21 = vadd.f32 %v1543_v29, %v1535_v28 }
0x1da6   :  { %2910 = vtanh.f32 %v1545_v21  ;;  %v1641_v51 = vrot.slane %v1545_v21, 6 }
0x1db0   :  { %v2911_v30 = vpop.eup %2910 }
0x1db1   :  { %1548 = vrot.lane.b32.xlu1 %v2911_v30, %s3065_s3 }
0x1e23   :  { %v1549_v31 = vpop.permute.xlu1 %1548 }
0x1e24   :  { %v1551_v25 = vmul.f32 %v1549_v31, %v1531_v24 }
0x1e26   :  { %v1553_v32 = vrot.slane %v1551_v25, 2 }
0x1e28   :  { %1554 = vrot.lane.b32.xlu0 %v1553_v32, %s3055_s27 }
0x1e9a   :  { %v1555_v34 = vpop.permute.xlu0 %1554 }
0x1e9b   :  { %2620 = vmatmul.mubr.msk.f32.vlgmr.msra.gmra.mrb[14].mxu0 %vm196_vm3, %v1555_v34 }
0x1e9c   :  { %2790 = vmatpush3.bf16.msra.mxu0 %v3365_v38  ;;  %2641 = vmatprep.mubr.msk.f32.mxu0 %vm3064_vm4, %v3063_v18 }
0x1e9d   :  { %2791 = vmatprep.subr.bf16.mxu0 %v3062_v9 }
0x1ea0   :  { %2793 = vmatpush3.bf16.msra.mxu0 %v3375_v45 }
0x1ea1   :  { %2800 = vmatprep.subr.bf16.mxu0 %v3062_v9 }
0x1f6e   :  { %v1624_v36 = vpop.f32.mrb[14].mxu0 }
0x1f6f   :  { %v1629_v37 = vrot.slane %v1624_v36, 4  ;;  %v2621_v39 = vpop.f32.mrb[15].mxu0 }
0x1f71   :  { %v1631_v41 = vadd.f32 %v1629_v37, %v3407_v58 }
0x1f73   :  { %v2341_v42 = vmul.f32 -1.442695, %v1631_v41 }
0x1f75   :  { %2912 = vpow2.f32 %v2341_v42 }
0x1f76   :  { %2914 = vtanh.f32 %v1631_v41 }
0x1f7f   :  { %v2913_v43 = vpop.eup %2912 }
0x1f80   :  { %v1636_v44 = vadd.f32 1.0, %v2913_v43  ;;  %v2915_v46 = vpop.eup %2914 }
0x1f82   :  { %2916 = vrcp.f32 %v1636_v44 }
0x1f8c   :  { %v2917_v47 = vpop.eup %2916 }
0x1f8d   :  { %v1639_v48 = vsel %vm3229_vm7, %v2915_v46, %v2917_v47 }
0x1f8e   :  { %1645 = vrot.lane.b32.xlu1 %v1639_v48, %s3065_s3  ;;  %v1643_v52 = vmul.f32 %v1641_v51, %v1639_v48 }
0x2000   :  { %v1646_v49 = vpop.permute.xlu1 %1645 }
0x2001   :  { %v1648_v50 = vmul.f32 %v1646_v49, %v1639_v48 }
0x2003   :  { %1650 = vrot.lane.b32.xlu0 %v1648_v50, %s3055_s27 }
0x2075   :  { %v1651_v53 = vpop.permute.xlu0 %1650 }
0x2076   :  { %v1653_v54 = vadd.f32 %v1651_v53, %v1643_v52 }
0x2078   :  { %2918 = vtanh.f32 %v1653_v54  ;;  %v1749_v11 = vrot.slane %v1653_v54, 6 }
0x2082   :  { %v2919_v55 = vpop.eup %2918 }
0x2083   :  { %1656 = vrot.lane.b32.xlu1 %v2919_v55, %s3065_s3 }
0x20f5   :  { %v1657_v35 = vpop.permute.xlu1 %1656 }
0x20f6   :  { %v1659_v57 = vmul.f32 %v1657_v35, %v1639_v48 }
0x20f8   :  { %v1661_v59 = vrot.slane %v1659_v57, 4 }
0x20fa   :  { %1662 = vrot.lane.b32.xlu0 %v1661_v59, %s3055_s27 }
0x216c   :  { %v1663_v60 = vpop.permute.xlu0 %1662 }
0x216d   :  { %2631 = vmatmul.mubr.msk.f32.vlgmr.msra.gmra.mrb[14].mxu1 %vm196_vm3, %v1663_v60 }
0x216e   :  { %2796 = vmatpush3.bf16.msra.mxu1 %v3365_v38  ;;  %2652 = vmatprep.mubr.msk.f32.mxu1 %vm3064_vm4, %v3063_v18 }
0x216f   :  { %2797 = vmatprep.subr.bf16.mxu1 %v3062_v9 }
0x2172   :  { %2799 = vmatpush3.bf16.msra.mxu1 %v3375_v45 }
0x2173   :  { %2806 = vmatprep.subr.bf16.mxu1 %v3062_v9 }
0x2240   :  { %v1732_v62 = vpop.f32.mrb[14].mxu1 }
0x2241   :  { %v1737_v63 = vrot.slane %v1732_v62, 2  ;;  %v2632_v0 = vpop.f32.mrb[15].mxu1 }
0x2243   :  { %v1739_v1 = vadd.f32 %v1737_v63, %v3407_v58 }
0x2245   :  { %v2343_v2 = vmul.f32 -1.442695, %v1739_v1 }
0x2247   :  { %2920 = vpow2.f32 %v2343_v2 }
0x2248   :  { %2922 = vtanh.f32 %v1739_v1 }
0x2251   :  { %v2921_v3 = vpop.eup %2920 }
0x2252   :  { %v1744_v4 = vadd.f32 1.0, %v2921_v3  ;;  %v2923_v5 = vpop.eup %2922 }
0x2254   :  { %2924 = vrcp.f32 %v1744_v4 }
0x225e   :  { %v2925_v6 = vpop.eup %2924 }
0x225f   :  { %v1747_v7 = vsel %vm3229_vm7, %v2923_v5, %v2925_v6 }
0x2260   :  { %1753 = vrot.lane.b32.xlu1 %v1747_v7, %s3065_s3  ;;  %v1751_v12 = vmul.f32 %v1749_v11, %v1747_v7 }
0x22d2   :  { %v1754_v8 = vpop.permute.xlu1 %1753 }
0x22d3   :  { %v1756_v10 = vmul.f32 %v1754_v8, %v1747_v7 }
0x22d5   :  { %1758 = vrot.lane.b32.xlu0 %v1756_v10, %s3055_s27 }
0x2347   :  { %v1759_v58 = vpop.permute.xlu0 %1758 }
0x2348   :  { %v1761_v13 = vadd.f32 %v1759_v58, %v1751_v12 }
0x234a   :  { %2926 = vtanh.f32 %v1761_v13  ;;  %v1854_v30 = vrot.slane %v1761_v13, 6 }
0x2354   :  { %v2927_v14 = vpop.eup %2926 }
0x2355   :  { %1764 = vrot.lane.b32.xlu1 %v2927_v14, %s3065_s3 }
0x23c7   :  { %v1765_v15 = vpop.permute.xlu1 %1764 }
0x23c8   :  { %v1767_v33 = vmul.f32 %v1765_v15, %v1747_v7 }
0x23ca   :  { %v1769_v16 = vrot.slane %v1767_v33, 6 }
0x23cc   :  { %1770 = vrot.lane.b32.xlu0 %v1769_v16, %s3055_s27 }
0x243e   :  { %v1771_v17 = vpop.permute.xlu0 %1770 }
0x243f   :  { %2642 = vmatmul.mubr.msk.f32.vlgmr.msra.gmra.mrb[16].mxu0 %vm196_vm3, %v1771_v17 }
0x2440   :  { %2802 = vmatpush3.bf16.msra.mxu0 %v3365_v38  ;;  %2663 = vmatprep.mubr.msk.f32.mxu0 %vm3064_vm4, %v3063_v18 }
0x2441   :  { %2803 = vmatprep.subr.bf16.mxu0 %v3062_v9 }
0x2444   :  { %2805 = vmatpush3.bf16.msra.mxu0 %v3375_v45 }
0x2445   :  { %2812 = vmatprep.subr.bf16.mxu0 %v3062_v9 }
0x2512   :  { %v1840_v19 = vpop.f32.mrb[16].mxu0 }
0x2513   :  { %v1844_v20 = vadd.f32 %v1840_v19, %v3405_v56  ;;  %v2643_v22 = vpop.f32.mrb[17].mxu0 }
0x2515   :  { %v2345_v23 = vmul.f32 -1.442695, %v1844_v20 }
0x2517   :  { %2928 = vpow2.f32 %v2345_v23 }
0x2518   :  { %2930 = vtanh.f32 %v1844_v20 }
0x2521   :  { %v2929_v24 = vpop.eup %2928 }
0x2522   :  { %v1849_v61 = vadd.f32 1.0, %v2929_v24  ;;  %v2931_v26 = vpop.eup %2930 }
0x2524   :  { %2932 = vrcp.f32 %v1849_v61 }
0x252e   :  { %v2933_v27 = vpop.eup %2932 }
0x252f   :  { %v1852_v28 = vsel %vm3229_vm7, %v2931_v26, %v2933_v27 }
0x2530   :  { %1858 = vrot.lane.b32.xlu1 %v1852_v28, %s3065_s3  ;;  %v1856_v31 = vmul.f32 %v1854_v30, %v1852_v28 }
0x25a2   :  { %v1859_v29 = vpop.permute.xlu1 %1858 }
0x25a3   :  { %v1861_v21 = vmul.f32 %v1859_v29, %v1852_v28 }
0x25a5   :  { %1863 = vrot.lane.b32.xlu0 %v1861_v21, %s3055_s27 }
0x2617   :  { %v1864_v25 = vpop.permute.xlu0 %1863 }
0x2618   :  { %v1866_v32 = vadd.f32 %v1864_v25, %v1856_v31 }
0x261a   :  { %2934 = vtanh.f32 %v1866_v32  ;;  %v1961_v52 = vrot.slane %v1866_v32, 6 }
0x2624   :  { %v2935_v34 = vpop.eup %2934 }
0x2625   :  { %1869 = vrot.lane.b32.xlu1 %v2935_v34, %s3065_s3  ;;  %v2196_v34 = vld [vmem:[%s3538_s9] sm:$0xff] }
0x2697   :  { %v1870_v36 = vpop.permute.xlu1 %1869 }
0x2698   :  { %v1872_v37 = vmul.f32 %v1870_v36, %v1852_v28  ;;  %v2198_v36 = vld [vmem:[%s3538_s9 + $0x10] sm:$0xff] }
0x269a   :  { %1874 = vrot.lane.b32.xlu0 %v1872_v37, %s3055_s27  ;;  %v2813_v37 = vpack.c.bf16 %v2197_v40, %v2196_v34 }
0x270c   :  { %v1875_v39 = vpop.permute.xlu0 %1874 }
0x270d   :  { %2653 = vmatmul.mubr.msk.f32.vlgmr.msra.gmra.mrb[16].mxu1 %vm196_vm3, %v1875_v39  ;;  %v2199_v39 = vld [vmem:[%s3538_s9 + $0x18] sm:$0xff]  ;;  %s3026_s9 = scalar_lea.vmem %s2292_s22, 32 }
0x270e   :  { %2808 = vmatpush3.bf16.msra.mxu1 %v3365_v38  ;;  %2674 = vmatprep.mubr.msk.f32.mxu1 %vm3064_vm4, %v3063_v18  ;;  %p3027_p10 = scmp.ne.s32.totalorder %s2292_s22, %s3026_s9  ;;  %p3032_p12 = scmp.lt.s32.totalorder %s3026_s9, %s3026_s9 }
0x270f   :  { %2809 = vmatprep.subr.bf16.mxu1 %v3062_v9 }
0x2710   :  { %p3033_p13 = por %p3032_p12, %p3031_p11 }
0x2712   :  { %2811 = vmatpush3.bf16.msra.mxu1 %v3375_v45  ;;  %p3034_p0 = pnand %p3033_p13, %p3027_p10 }
0x27e0   :  { %v1944_v41 = vpop.f32.mrb[16].mxu1 }
0x27e1   :  { %v1949_v42 = vrot.slane %v1944_v41, 6  ;;  %v2654_v43 = vpop.f32.mrb[17].mxu1  ;;  %v2816_v41 = vpack.c.bf16 %v2199_v39, %v2198_v36 }
0x27e3   :  { %v1951_v44 = vadd.f32 %v1949_v42, %v3405_v56 }
0x27e5   :  { %v2347_v46 = vmul.f32 -1.442695, %v1951_v44 }
0x27e7   :  { %2936 = vpow2.f32 %v2347_v46 }
0x27e8   :  { %2938 = vtanh.f32 %v1951_v44 }
0x27f1   :  { %v2937_v47 = vpop.eup %2936 }
0x27f2   :  { %v1956_v48 = vadd.f32 1.0, %v2937_v47  ;;  %v2939_v49 = vpop.eup %2938 }
0x27f4   :  { %2940 = vrcp.f32 %v1956_v48  ;;  %v2352_v48 = vld [vmem:[#allocation7] ss:$0 sm:$0xff] }
0x27fe   :  { %v2941_v38 = vpop.eup %2940 }
0x27ff   :  { %v1959_v50 = vsel %vm3229_vm7, %v2939_v49, %v2941_v38 }
0x2800   :  { %1965 = vrot.lane.b32.xlu1 %v1959_v50, %s3065_s3  ;;  %v1963_v53 = vmul.f32 %v1961_v52, %v1959_v50 }
0x2872   :  { %v1966_v51 = vpop.permute.xlu1 %1965 }
0x2873   :  { %v1968_v45 = vmul.f32 %v1966_v51, %v1959_v50 }
0x2875   :  { %1970 = vrot.lane.b32.xlu0 %v1968_v45, %s3055_s27 }
0x28e7   :  { %v1971_v54 = vpop.permute.xlu0 %1970 }
0x28e8   :  { %v1973_v55 = vadd.f32 %v1971_v54, %v1963_v53 }
0x28ea   :  { %2942 = vtanh.f32 %v1973_v55  ;;  %v2069_v11 = vrot.slane %v1973_v55, 6 }
0x28f4   :  { %v2943_v35 = vpop.eup %2942 }
0x28f5   :  { %1976 = vrot.lane.b32.xlu1 %v2943_v35, %s3065_s3 }
0x2967   :  { %v1977_v57 = vpop.permute.xlu1 %1976 }
0x2968   :  { %v1979_v59 = vmul.f32 %v1977_v57, %v1959_v50 }
0x296a   :  { %v1981_v60 = vrot.slane %v1979_v59, 2 }
0x296c   :  { %1982 = vrot.lane.b32.xlu0 %v1981_v60, %s3055_s27 }
0x29de   :  { %v1983_v62 = vpop.permute.xlu0 %1982 }
0x29df   :  { %2664 = vmatmul.mubr.msk.f32.vlgmr.msra.gmra.mrb[18].mxu0 %vm196_vm3, %v1983_v62 }
0x29e0   :  { %2685 = vmatprep.mubr.msk.f32.mxu0 %vm3064_vm4, %v3063_v18  ;;  %2814 = vmatpush3.bf16.msra.mxu0 %v2813_v37 }
0x29e1   :  { %2815 = vmatprep.subr.bf16.mxu0 %v3062_v9 }
0x29e4   :  { %2817 = vmatpush3.bf16.msra.mxu0 %v2816_v41 }
0x2ab2   :  { %v2052_v63 = vpop.f32.mrb[18].mxu0 }
0x2ab3   :  { %v2057_v0 = vrot.slane %v2052_v63, 4  ;;  %v2665_v1 = vpop.f32.mrb[19].mxu0 }
0x2ab5   :  { %v2059_v2 = vadd.f32 %v2057_v0, %v3405_v56 }
0x2ab7   :  { %v2349_v3 = vmul.f32 -1.442695, %v2059_v2 }
0x2ab9   :  { %2944 = vpow2.f32 %v2349_v3 }
0x2aba   :  { %2946 = vtanh.f32 %v2059_v2 }
0x2ac3   :  { %v2945_v4 = vpop.eup %2944 }
0x2ac4   :  { %v2064_v5 = vadd.f32 1.0, %v2945_v4  ;;  %v2947_v6 = vpop.eup %2946 }
0x2ac6   :  { %2948 = vrcp.f32 %v2064_v5 }
0x2ad0   :  { %v2949_v7 = vpop.eup %2948 }
0x2ad1   :  { %v2067_v8 = vsel %vm3229_vm7, %v2947_v6, %v2949_v7 }
0x2ad2   :  { %2073 = vrot.lane.b32.xlu1 %v2067_v8, %s3065_s3  ;;  %v2071_v12 = vmul.f32 %v2069_v11, %v2067_v8 }
0x2b44   :  { %v2074_v10 = vpop.permute.xlu1 %2073 }
0x2b45   :  { %v2076_v18 = vmul.f32 %v2074_v10, %v2067_v8 }
0x2b47   :  { %2078 = vrot.lane.b32.xlu0 %v2076_v18, %s3055_s27 }
0x2bb9   :  { %v2079_v58 = vpop.permute.xlu0 %2078 }
0x2bba   :  { %v2081_v13 = vadd.f32 %v2079_v58, %v2071_v12 }
0x2bbc   :  { %2950 = vtanh.f32 %v2081_v13  ;;  %v2177_v31 = vrot.slane %v2081_v13, 6 }
0x2bc6   :  { %v2951_v14 = vpop.eup %2950 }
0x2bc7   :  { %2084 = vrot.lane.b32.xlu1 %v2951_v14, %s3065_s3 }
0x2c39   :  { %v2085_v15 = vpop.permute.xlu1 %2084 }
0x2c3a   :  { %v2087_v33 = vmul.f32 %v2085_v15, %v2067_v8 }
0x2c3c   :  { %v2089_v16 = vrot.slane %v2087_v33, 4 }
0x2c3e   :  { %2090 = vrot.lane.b32.xlu0 %v2089_v16, %s3055_s27 }
0x2cb0   :  { %v2091_v17 = vpop.permute.xlu0 %2090 }
0x2cb1   :  { %2675 = vmatmul.mubr.msk.f32.vlgmr.msra.gmra.mrb[18].mxu1 %vm196_vm3, %v2091_v17 }
0x2d84   :  { %v2160_v19 = vpop.f32.mrb[18].mxu1 }
0x2d85   :  { %v2165_v20 = vrot.slane %v2160_v19, 2  ;;  %v2676_v22 = vpop.f32.mrb[19].mxu1 }
0x2d87   :  { %v2167_v23 = vadd.f32 %v2165_v20, %v3405_v56 }
0x2d89   :  { %v2351_v24 = vmul.f32 -1.442695, %v2167_v23 }
0x2d8b   :  { %2952 = vpow2.f32 %v2351_v24 }
0x2d8c   :  { %2954 = vtanh.f32 %v2167_v23 }
0x2d95   :  { %v2953_v61 = vpop.eup %2952 }
0x2d96   :  { %v2172_v26 = vadd.f32 1.0, %v2953_v61  ;;  %v2955_v27 = vpop.eup %2954 }
0x2d98   :  { %2956 = vrcp.f32 %v2172_v26 }
0x2da2   :  { %v2957_v28 = vpop.eup %2956 }
0x2da3   :  { %v2175_v29 = vsel %vm3229_vm7, %v2955_v27, %v2957_v28 }
0x2da4   :  { %2181 = vrot.lane.b32.xlu1 %v2175_v29, %s3065_s3  ;;  %v2179_v25 = vmul.f32 %v2177_v31, %v2175_v29 }
0x2e16   :  { %v2182_v21 = vpop.permute.xlu1 %2181 }
0x2e17   :  { %v2184_v30 = vmul.f32 %v2182_v21, %v2175_v29 }
0x2e19   :  { %2186 = vrot.lane.b32.xlu0 %v2184_v30, %s3055_s27 }
0x2e8b   :  { %v2187_v56 = vpop.permute.xlu0 %2186 }
0x2e8c   :  { %v2189_v32 = vadd.f32 %v2187_v56, %v2179_v25 }
0x2e8e   :  { %2958 = vtanh.f32 %v2189_v32 }
0x2e98   :  { %v2959_v42 = vpop.eup %2958 }
0x2e99   :  { %2192 = vrot.lane.b32.xlu1 %v2959_v42, %s3065_s3 }
0x2f0b   :  { %v2193_v43 = vpop.permute.xlu1 %2192 }
0x2f0c   :  { %v2195_v44 = vmul.f32 %v2193_v43, %v2175_v29 }
0x2f0e   :  { %v2208_v46 = vrot.slane %v2195_v44, 6 }
0x2f10   :  { %2209 = vrot.lane.b32.xlu0 %v2208_v46, %s3055_s27 }
0x2f82   :  { %v2210_v47 = vpop.permute.xlu0 %2209 }
0x2f83   :  { %2686 = vmatmul.mubr.msk.f32.vlgmr.msra.gmra.mrb[20].mxu0 %vm196_vm3, %v2210_v47 }
0x3056   :  { %v2279_v49 = vpop.f32.mrb[20].mxu0 }
0x3057   :  { %v2280_v38 = vadd.f32 %v2352_v48, %v2279_v49  ;;  %v2687_v50 = vpop.f32.mrb[21].mxu0 }
0x3059   :  { %2284 = vst.msk [vmem:[#allocation8] sm:$0x3] %vm2283_vm11, %v2280_v38 }
0x305a   :  { %3037 = shalt.err (!%p3034_p0)
}
0x305b   :  { %s3038_s6 = scalar_lea.hbm %s3540_s11, 32 }
0x305c   :  { %p3039_p1 = scmp.ne.s32.totalorder %s3540_s11, %s3038_s6  ;;  %p3042_p2 = scmp.lt.u32.totalorder %s3038_s6, %s3540_s11 }
0x305e   :  { %p3044_p3 = pnand %p3042_p2, %p3039_p1 }
0x3060   :  { %3047 = shalt.err (!%p3044_p3)
}
0x3061   :  { %2294 = dma.vmem_to_hbm [thread:$0]  %s2292_s22, 32, %s3540_s11, [#allocation4]  }
0x3062   :  { %3052 = dma.done.wait [#allocation4], 32  }
0x3063   :  { %3053 = vsyncadd [#allocation4], 4294967264 }
0x3064   :  { %2298 = vsyncpa [#allocation3], 1 }
0x3065   :  { %2299 = vsyncpa [#allocation6], 1 }
0x3066   :  { %2300 = vsyncpa [#allocation4], 1 }

</bundles_post_ra>
